<compile_context>
chip_gen: v5e
topology: v5e:2x2
jax: 0.10.0
libtpu: 0.0.40
codegen_flags: <defaults>
</compile_context>

<pallas_src>
import functools
import numpy as np
import jax
import jax.numpy as jnp
from jax.experimental import pallas as pl
from jax.experimental.pallas import tpu as pltpu


def _layernorm(x, w, b, eps=1e-5):
    mu = jnp.mean(x, axis=-1, keepdims=True)
    xc = x - mu
    var = jnp.mean(xc * xc, axis=-1, keepdims=True)
    return xc * jax.lax.rsqrt(var + eps) * w + b


def transformer_kernel(depth, heads, dim_head,
                       x_ref, wq_ref, wk_ref, wv_ref, wo_ref, bo_ref,
                       lnw_ref, lnb_ref,
                       wff1_ref, bff1_ref, wff2_ref, bff2_ref,
                       xout_ref, dots_ref):
    N = x_ref.shape[1]
    D = x_ref.shape[2]
    x = x_ref[0].astype(jnp.float32)          # (N, D), resident for all layers
    ln_w = lnw_ref[...]                        # (1, D) shared LayerNorm
    ln_b = lnb_ref[...]
    scale = jnp.float32(dim_head ** -0.5)

    dots = None
    for l in range(depth):                     # static, fully fused depth loop
        # ---- attention (head-batched) ------------------------------------
        xb = x.astype(jnp.bfloat16)
        xh = jnp.broadcast_to(xb[None], (heads, N, D))          # (H, N, D)
        q = jnp.einsum('hnd,hdk->hnk', xh, wq_ref[l],
                       preferred_element_type=jnp.float32)      # (H, N, dh)
        k = jnp.einsum('hnd,hdk->hnk', xh, wk_ref[l],
                       preferred_element_type=jnp.float32)
        v = jnp.einsum('hnd,hdk->hnk', xh, wv_ref[l],           # mask pre-folded
                       preferred_element_type=jnp.float32)

        dots = jnp.einsum('hnk,hmk->hnm',
                          q.astype(jnp.bfloat16), k.astype(jnp.bfloat16),
                          preferred_element_type=jnp.float32) * scale   # (H, N, N)

        m = jnp.max(dots, axis=-1, keepdims=True)
        e = jnp.exp(dots - m)
        s = jnp.sum(e, axis=-1, keepdims=True)
        attn = e * pl.reciprocal(s, approx=True)                # softmax(dim=-1)

        outh = jnp.einsum('hnm,hmk->hnk',
                          attn.astype(jnp.bfloat16), v.astype(jnp.bfloat16),
                          preferred_element_type=jnp.float32)   # (H, N, dh)

        # to_out Linear fused per head, then reduced over heads
        proj = jnp.einsum('hnk,hkd->hnd',
                          outh.astype(jnp.bfloat16), wo_ref[l],
                          preferred_element_type=jnp.float32)   # (H, N, D)
        attn_out = jnp.sum(proj, axis=0) + bo_ref[l]            # (N, D)

        x = _layernorm(attn_out + x, ln_w, ln_b)

        # ---- feed-forward --------------------------------------------------
        h1 = jnp.dot(x.astype(jnp.bfloat16), wff1_ref[l],
                     preferred_element_type=jnp.float32) + bff1_ref[l]
        # exact (erf-based) GELU, matching torch.nn.GELU default
        h1 = 0.5 * h1 * (1.0 + jax.lax.erf(h1 * jnp.float32(0.7071067811865476)))
        ff = jnp.dot(h1.astype(jnp.bfloat16), wff2_ref[l],
                     preferred_element_type=jnp.float32) + bff2_ref[l]

        x = _layernorm(ff + x, ln_w, ln_b)

    xout_ref[0] = x.astype(xout_ref.dtype)
    # only last layer's (scaled, pre-softmax, pre-mask) dots are returned
    dots_ref[0] = dots.astype(dots_ref.dtype)


def _repack_params(params, head_masks, heads, dim_head):
    """Stack per-layer weights, split QKV head-major, fold head mask into Wv, cast to bf16."""
    inner = heads * dim_head
    wq, wk, wv, wo, bo = [], [], [], [], []
    wf1, bf1, wf2, bf2 = [], [], [], []
    for (wqkv, wout, bout, wff1, bff1, wff2, bff2), mask in zip(params, head_masks):
        D = wqkv.shape[0]

        def per_head(w):  # (D, inner) -> (heads, D, dim_head), head-major columns
            return jnp.transpose(w.reshape(D, heads, dim_head), (1, 0, 2))

        wq.append(per_head(wqkv[:, 0 * inner:1 * inner]))
        wk.append(per_head(wqkv[:, 1 * inner:2 * inner]))
        # post-softmax per-head mask folds exactly into the V projection
        wv.append(per_head(wqkv[:, 2 * inner:3 * inner]) * mask[:, None, None])
        wo.append(wout.reshape(heads, dim_head, D))
        bo.append(bout.reshape(1, D))
        wf1.append(wff1)
        bf1.append(bff1.reshape(1, -1))
        wf2.append(wff2)
        bf2.append(bff2.reshape(1, D))

    stack = lambda xs, dt: jnp.stack(xs).astype(dt)
    return (stack(wq, jnp.bfloat16), stack(wk, jnp.bfloat16), stack(wv, jnp.bfloat16),
            stack(wo, jnp.bfloat16), stack(bo, jnp.float32),
            stack(wf1, jnp.bfloat16), stack(bf1, jnp.float32),
            stack(wf2, jnp.bfloat16), stack(bf2, jnp.float32))


def transformer_postnorm_give(x, params, ln_w, ln_b, head_masks,
                              heads, dim_head, mlp_dim):
    """Full Transformer_postnorm_give forward in a single fused pallas_call."""
    B, N, D = x.shape
    depth = len(params)
    wq, wk, wv, wo, bo, wf1, bf1, wf2, bf2 = _repack_params(
        params, head_masks, heads, dim_head)

    kernel = functools.partial(transformer_kernel, depth, heads, dim_head)

    def full_spec(arr):
        zeros = (0,) * arr.ndim
        return pl.BlockSpec(arr.shape, lambda b: zeros)

    weights = (wq, wk, wv, wo, bo, ln_w, ln_b, wf1, bf1, wf2, bf2)

    in_specs = [pl.BlockSpec((1, N, D), lambda b: (b, 0, 0))]  # x
    in_specs += [full_spec(w) for w in weights]

    out_specs = (
        pl.BlockSpec((1, N, D), lambda b: (b, 0, 0)),
        pl.BlockSpec((1, heads, N, N), lambda b: (b, 0, 0, 0)),
    )
    out_shape = (
        jax.ShapeDtypeStruct((B, N, D), x.dtype),
        jax.ShapeDtypeStruct((B, heads, N, N), jnp.float32),
    )

    x_out, give = pl.pallas_call(
        kernel,
        grid=(B,),
        in_specs=in_specs,
        out_specs=out_specs,
        out_shape=out_shape,
        compiler_params=pltpu.CompilerParams(dimension_semantics=("parallel",)),
    )(x, *weights)
    return x_out, give


if __name__ == "__main__":
    # small shapes consistent with the module
    B, N = 2, 8
    dim, depth, heads, dim_head, mlp_dim = 32, 2, 4, 8, 64
    inner = heads * dim_head
    p = 0.3  # probability of "giving up" (zeroing) a head

    key = jax.random.PRNGKey(0)
    keys = jax.random.split(key, 1 + depth)
    x = jax.random.normal(keys[0], (B, N, dim), jnp.float32)

    def _w(k, shape):
        return 0.02 * jax.random.normal(k, shape, jnp.float32)

    params = []
    for l in range(depth):
        kq, ko, kf1, kf2 = jax.random.split(keys[1 + l], 4)
        wqkv = _w(kq, (dim, 3 * inner))              # to_qkv (bias=False)
        wout = _w(ko, (inner, dim))                  # to_out Linear
        bout = jnp.zeros((dim,), jnp.float32)
        wff1 = _w(kf1, (dim, mlp_dim))
        bff1 = jnp.zeros((mlp_dim,), jnp.float32)
        wff2 = _w(kf2, (mlp_dim, dim))
        bff2 = jnp.zeros((dim,), jnp.float32)
        params.append((wqkv, wout, bout, wff1, bff1, wff2, bff2))

    # shared LayerNorm (single nn.LayerNorm instance reused everywhere)
    ln_w = jnp.ones((1, dim), jnp.float32)
    ln_b = jnp.zeros((1, dim), jnp.float32)

    # deterministic stand-in for `np.random.binomial(1, p, size=heads)` per layer
    # TODO(synk): host-side RNG stands in for the per-forward numpy sampling in the reference.
    np.random.seed(0)
    head_masks = [
        jnp.asarray(
            np.where(np.random.binomial(1, p, size=heads) == 1, 0.0, 1.0),
            dtype=jnp.float32,
        )
        for _ in range(depth)
    ]

    x_out, give = transformer_postnorm_give(
        x, params, ln_w, ln_b, head_masks, heads, dim_head, mlp_dim
    )
    jax.block_until_ready((x_out, give))
    assert x_out.shape == (B, N, dim)
    assert give.shape == (B, heads, N, N)
    print("KERNEL_OK")
</pallas_src>

<mosaic_0001>
module attributes {stable_mosaic.version = 11 : i64} {
  func.func @transformer_kernel(%arg0: i32, %arg1: memref<1x8x32xf32, #tpu.memory_space<vmem>>, %arg2: memref<2x4x32x8xbf16, #tpu.memory_space<vmem>>, %arg3: memref<2x4x32x8xbf16, #tpu.memory_space<vmem>>, %arg4: memref<2x4x32x8xbf16, #tpu.memory_space<vmem>>, %arg5: memref<2x4x8x32xbf16, #tpu.memory_space<vmem>>, %arg6: memref<2x1x32xf32, #tpu.memory_space<vmem>>, %arg7: memref<1x32xf32, #tpu.memory_space<vmem>>, %arg8: memref<1x32xf32, #tpu.memory_space<vmem>>, %arg9: memref<2x32x64xbf16, #tpu.memory_space<vmem>>, %arg10: memref<2x1x64xf32, #tpu.memory_space<vmem>>, %arg11: memref<2x64x32xbf16, #tpu.memory_space<vmem>>, %arg12: memref<2x1x32xf32, #tpu.memory_space<vmem>>, %arg13: memref<1x8x32xf32, #tpu.memory_space<vmem>>, %arg14: memref<1x4x8x8xf32, #tpu.memory_space<vmem>>) attributes {dimension_semantics = [#tpu.dimension_semantics<parallel>], iteration_bounds = array<i64: 2>, scalar_prefetch = 0 : i64, scratch_operands = 0 : i64, tpu.core_type = #tpu.core_type<tc>, window_params = [{transform_indices = @transform_0, window_bounds = array<i64: 1, 8, 32>}, {pipeline_mode = #tpu.pipeline_mode<synchronous>, transform_indices = @transform_1, window_bounds = array<i64: 2, 4, 32, 8>}, {pipeline_mode = #tpu.pipeline_mode<synchronous>, transform_indices = @transform_2, window_bounds = array<i64: 2, 4, 32, 8>}, {pipeline_mode = #tpu.pipeline_mode<synchronous>, transform_indices = @transform_3, window_bounds = array<i64: 2, 4, 32, 8>}, {pipeline_mode = #tpu.pipeline_mode<synchronous>, transform_indices = @transform_4, window_bounds = array<i64: 2, 4, 8, 32>}, {pipeline_mode = #tpu.pipeline_mode<synchronous>, transform_indices = @transform_5, window_bounds = array<i64: 2, 1, 32>}, {pipeline_mode = #tpu.pipeline_mode<synchronous>, transform_indices = @transform_6, window_bounds = array<i64: 1, 32>}, {pipeline_mode = #tpu.pipeline_mode<synchronous>, transform_indices = @transform_7, window_bounds = array<i64: 1, 32>}, {pipeline_mode = #tpu.pipeline_mode<synchronous>, transform_indices = @transform_8, window_bounds = array<i64: 2, 32, 64>}, {pipeline_mode = #tpu.pipeline_mode<synchronous>, transform_indices = @transform_9, window_bounds = array<i64: 2, 1, 64>}, {pipeline_mode = #tpu.pipeline_mode<synchronous>, transform_indices = @transform_10, window_bounds = array<i64: 2, 64, 32>}, {pipeline_mode = #tpu.pipeline_mode<synchronous>, transform_indices = @transform_11, window_bounds = array<i64: 2, 1, 32>}, {transform_indices = @transform_12, window_bounds = array<i64: 1, 8, 32>}, {transform_indices = @transform_13, window_bounds = array<i64: 1, 4, 8, 8>}]} {
    %c0 = arith.constant 0 : index
    %c0_0 = arith.constant 0 : index
    %c0_1 = arith.constant 0 : index
    %0 = vector.load %arg1[%c0, %c0_0, %c0_1] : memref<1x8x32xf32, #tpu.memory_space<vmem>>, vector<1x8x32xf32>
    %1 = vector.shape_cast %0 : vector<1x8x32xf32> to vector<8x32xf32>
    %c0_2 = arith.constant 0 : index
    %c0_3 = arith.constant 0 : index
    %2 = vector.load %arg7[%c0_2, %c0_3] : memref<1x32xf32, #tpu.memory_space<vmem>>, vector<1x32xf32>
    %c0_4 = arith.constant 0 : index
    %c0_5 = arith.constant 0 : index
    %3 = vector.load %arg8[%c0_4, %c0_5] : memref<1x32xf32, #tpu.memory_space<vmem>>, vector<1x32xf32>
    %4 = arith.truncf %1 : vector<8x32xf32> to vector<8x32xbf16>
    %5 = vector.shape_cast %4 : vector<8x32xbf16> to vector<1x8x32xbf16>
    %6 = vector.shape_cast %5 : vector<1x8x32xbf16> to vector<1x8x32xbf16>
    %7 = vector.broadcast %6 : vector<1x8x32xbf16> to vector<4x8x32xbf16>
    %c0_6 = arith.constant 0 : index
    %c0_7 = arith.constant 0 : index
    %c0_8 = arith.constant 0 : index
    %c0_9 = arith.constant 0 : index
    %8 = vector.load %arg2[%c0_6, %c0_7, %c0_8, %c0_9] : memref<2x4x32x8xbf16, #tpu.memory_space<vmem>>, vector<1x4x32x8xbf16>
    %9 = vector.shape_cast %8 : vector<1x4x32x8xbf16> to vector<4x32x8xbf16>
    "tpu.trace_start"() <{level = 10 : i32, message = "hnd,hdk->hnk"}> : () -> ()
    %cst = arith.constant dense<0.000000e+00> : vector<4x8x8xf32>
    %10 = tpu.matmul %7, %9, %cst {dimension_numbers = #tpu.dot_dimension_numbers<[2], [1], [1], [2], [0, 0, 0, 1, 1, 2], [0], [0]>} : vector<4x8x32xbf16>, vector<4x32x8xbf16>, vector<4x8x8xf32> -> vector<4x8x8xf32>
    "tpu.trace_stop"() : () -> ()
    %c0_10 = arith.constant 0 : index
    %c0_11 = arith.constant 0 : index
    %c0_12 = arith.constant 0 : index
    %c0_13 = arith.constant 0 : index
    %11 = vector.load %arg3[%c0_10, %c0_11, %c0_12, %c0_13] : memref<2x4x32x8xbf16, #tpu.memory_space<vmem>>, vector<1x4x32x8xbf16>
    %12 = vector.shape_cast %11 : vector<1x4x32x8xbf16> to vector<4x32x8xbf16>
    "tpu.trace_start"() <{level = 10 : i32, message = "hnd,hdk->hnk"}> : () -> ()
    %cst_14 = arith.constant dense<0.000000e+00> : vector<4x8x8xf32>
    %13 = tpu.matmul %7, %12, %cst_14 {dimension_numbers = #tpu.dot_dimension_numbers<[2], [1], [1], [2], [0, 0, 0, 1, 1, 2], [0], [0]>} : vector<4x8x32xbf16>, vector<4x32x8xbf16>, vector<4x8x8xf32> -> vector<4x8x8xf32>
    "tpu.trace_stop"() : () -> ()
    %c0_15 = arith.constant 0 : index
    %c0_16 = arith.constant 0 : index
    %c0_17 = arith.constant 0 : index
    %c0_18 = arith.constant 0 : index
    %14 = vector.load %arg4[%c0_15, %c0_16, %c0_17, %c0_18] : memref<2x4x32x8xbf16, #tpu.memory_space<vmem>>, vector<1x4x32x8xbf16>
    %15 = vector.shape_cast %14 : vector<1x4x32x8xbf16> to vector<4x32x8xbf16>
    "tpu.trace_start"() <{level = 10 : i32, message = "hnd,hdk->hnk"}> : () -> ()
    %cst_19 = arith.constant dense<0.000000e+00> : vector<4x8x8xf32>
    %16 = tpu.matmul %7, %15, %cst_19 {dimension_numbers = #tpu.dot_dimension_numbers<[2], [1], [1], [2], [0, 0, 0, 1, 1, 2], [0], [0]>} : vector<4x8x32xbf16>, vector<4x32x8xbf16>, vector<4x8x8xf32> -> vector<4x8x8xf32>
    "tpu.trace_stop"() : () -> ()
    %17 = arith.truncf %10 : vector<4x8x8xf32> to vector<4x8x8xbf16>
    %18 = arith.truncf %13 : vector<4x8x8xf32> to vector<4x8x8xbf16>
    "tpu.trace_start"() <{level = 10 : i32, message = "hnk,hmk->hnm"}> : () -> ()
    %cst_20 = arith.constant dense<0.000000e+00> : vector<4x8x8xf32>
    %19 = tpu.matmul %17, %18, %cst_20 {dimension_numbers = #tpu.dot_dimension_numbers<[2], [2], [1], [1], [0, 0, 0, 1, 1, 1], [0], [0]>} : vector<4x8x8xbf16>, vector<4x8x8xbf16>, vector<4x8x8xf32> -> vector<4x8x8xf32>
    "tpu.trace_stop"() : () -> ()
    %cst_21 = arith.constant 0.353553385 : f32
    %20 = vector.broadcast %cst_21 : f32 to vector<4x8x8xf32>
    %21 = arith.mulf %19, %20 : vector<4x8x8xf32>
    %cst_22 = arith.constant dense<0xFF800000> : vector<4x8xf32>
    %22 = vector.multi_reduction <maximumf>, %21, %cst_22 [2] : vector<4x8x8xf32> to vector<4x8xf32>
    %23 = vector.shape_cast %22 : vector<4x8xf32> to vector<4x8x1xf32>
    %24 = vector.broadcast %23 : vector<4x8x1xf32> to vector<4x8x8xf32>
    %25 = arith.subf %21, %24 : vector<4x8x8xf32>
    %26 = math.exp %25 : vector<4x8x8xf32>
    %cst_23 = arith.constant dense<0.000000e+00> : vector<4x8xf32>
    %27 = vector.multi_reduction <add>, %26, %cst_23 [2] : vector<4x8x8xf32> to vector<4x8xf32>
    %28 = vector.shape_cast %27 : vector<4x8xf32> to vector<4x8x1xf32>
    %29 = tpu.reciprocal %28 {approx = true} : vector<4x8x1xf32> -> vector<4x8x1xf32>
    %30 = vector.broadcast %29 : vector<4x8x1xf32> to vector<4x8x8xf32>
    %31 = arith.mulf %26, %30 : vector<4x8x8xf32>
    %32 = arith.truncf %31 : vector<4x8x8xf32> to vector<4x8x8xbf16>
    %33 = arith.truncf %16 : vector<4x8x8xf32> to vector<4x8x8xbf16>
    "tpu.trace_start"() <{level = 10 : i32, message = "hnm,hmk->hnk"}> : () -> ()
    %cst_24 = arith.constant dense<0.000000e+00> : vector<4x8x8xf32>
    %34 = tpu.matmul %32, %33, %cst_24 {dimension_numbers = #tpu.dot_dimension_numbers<[2], [1], [1], [2], [0, 0, 0, 1, 1, 2], [0], [0]>} : vector<4x8x8xbf16>, vector<4x8x8xbf16>, vector<4x8x8xf32> -> vector<4x8x8xf32>
    "tpu.trace_stop"() : () -> ()
    %35 = arith.truncf %34 : vector<4x8x8xf32> to vector<4x8x8xbf16>
    %c0_25 = arith.constant 0 : index
    %c0_26 = arith.constant 0 : index
    %c0_27 = arith.constant 0 : index
    %c0_28 = arith.constant 0 : index
    %36 = vector.load %arg5[%c0_25, %c0_26, %c0_27, %c0_28] : memref<2x4x8x32xbf16, #tpu.memory_space<vmem>>, vector<1x4x8x32xbf16>
    %37 = vector.shape_cast %36 : vector<1x4x8x32xbf16> to vector<4x8x32xbf16>
    "tpu.trace_start"() <{level = 10 : i32, message = "hnk,hkd->hnd"}> : () -> ()
    %cst_29 = arith.constant dense<0.000000e+00> : vector<4x8x32xf32>
    %38 = tpu.matmul %35, %37, %cst_29 {dimension_numbers = #tpu.dot_dimension_numbers<[2], [1], [1], [2], [0, 0, 0, 1, 1, 2], [0], [0]>} : vector<4x8x8xbf16>, vector<4x8x32xbf16>, vector<4x8x32xf32> -> vector<4x8x32xf32>
    "tpu.trace_stop"() : () -> ()
    %cst_30 = arith.constant dense<0.000000e+00> : vector<8x32xf32>
    %39 = vector.multi_reduction <add>, %38, %cst_30 [0] : vector<4x8x32xf32> to vector<8x32xf32>
    %c0_31 = arith.constant 0 : index
    %c0_32 = arith.constant 0 : index
    %c0_33 = arith.constant 0 : index
    %40 = vector.load %arg6[%c0_31, %c0_32, %c0_33] : memref<2x1x32xf32, #tpu.memory_space<vmem>>, vector<1x1x32xf32>
    %41 = vector.shape_cast %40 : vector<1x1x32xf32> to vector<1x32xf32>
    %42 = vector.broadcast %41 : vector<1x32xf32> to vector<8x32xf32>
    %43 = arith.addf %39, %42 : vector<8x32xf32>
    %44 = arith.addf %43, %1 : vector<8x32xf32>
    %cst_34 = arith.constant dense<0.000000e+00> : vector<8xf32>
    %45 = vector.multi_reduction <add>, %44, %cst_34 [1] : vector<8x32xf32> to vector<8xf32>
    %46 = vector.shape_cast %45 : vector<8xf32> to vector<8x1xf32>
    %cst_35 = arith.constant 3.200000e+01 : f32
    %47 = vector.broadcast %cst_35 : f32 to vector<8x1xf32>
    %48 = arith.divf %46, %47 : vector<8x1xf32>
    %49 = vector.broadcast %48 : vector<8x1xf32> to vector<8x32xf32>
    %50 = arith.subf %44, %49 : vector<8x32xf32>
    %51 = arith.mulf %50, %50 : vector<8x32xf32>
    %cst_36 = arith.constant dense<0.000000e+00> : vector<8xf32>
    %52 = vector.multi_reduction <add>, %51, %cst_36 [1] : vector<8x32xf32> to vector<8xf32>
    %53 = vector.shape_cast %52 : vector<8xf32> to vector<8x1xf32>
    %cst_37 = arith.constant 3.200000e+01 : f32
    %54 = vector.broadcast %cst_37 : f32 to vector<8x1xf32>
    %55 = arith.divf %53, %54 : vector<8x1xf32>
    %cst_38 = arith.constant 9.99999974E-6 : f32
    %56 = vector.broadcast %cst_38 : f32 to vector<8x1xf32>
    %57 = arith.addf %55, %56 : vector<8x1xf32>
    %58 = math.rsqrt %57 : vector<8x1xf32>
    %59 = vector.broadcast %58 : vector<8x1xf32> to vector<8x32xf32>
    %60 = arith.mulf %50, %59 : vector<8x32xf32>
    %61 = vector.broadcast %2 : vector<1x32xf32> to vector<8x32xf32>
    %62 = arith.mulf %60, %61 : vector<8x32xf32>
    %63 = vector.broadcast %3 : vector<1x32xf32> to vector<8x32xf32>
    %64 = arith.addf %62, %63 : vector<8x32xf32>
    %65 = arith.truncf %64 : vector<8x32xf32> to vector<8x32xbf16>
    %c0_39 = arith.constant 0 : index
    %c0_40 = arith.constant 0 : index
    %c0_41 = arith.constant 0 : index
    %66 = vector.load %arg9[%c0_39, %c0_40, %c0_41] : memref<2x32x64xbf16, #tpu.memory_space<vmem>>, vector<1x32x64xbf16>
    %67 = vector.shape_cast %66 : vector<1x32x64xbf16> to vector<32x64xbf16>
    %cst_42 = arith.constant dense<0.000000e+00> : vector<8x64xf32>
    %68 = tpu.matmul %65, %67, %cst_42 {dimension_numbers = #tpu.dot_dimension_numbers<[1], [0], [0], [1], [0, 0, 1, 1], [], []>} : vector<8x32xbf16>, vector<32x64xbf16>, vector<8x64xf32> -> vector<8x64xf32>
    %c0_43 = arith.constant 0 : index
    %c0_44 = arith.constant 0 : index
    %c0_45 = arith.constant 0 : index
    %69 = vector.load %arg10[%c0_43, %c0_44, %c0_45] : memref<2x1x64xf32, #tpu.memory_space<vmem>>, vector<1x1x64xf32>
    %70 = vector.shape_cast %69 : vector<1x1x64xf32> to vector<1x64xf32>
    %71 = vector.broadcast %70 : vector<1x64xf32> to vector<8x64xf32>
    %72 = arith.addf %68, %71 : vector<8x64xf32>
    %cst_46 = arith.constant 5.000000e-01 : f32
    %73 = vector.broadcast %cst_46 : f32 to vector<8x64xf32>
    %74 = arith.mulf %73, %72 : vector<8x64xf32>
    %cst_47 = arith.constant 0.707106769 : f32
    %75 = vector.broadcast %cst_47 : f32 to vector<8x64xf32>
    %76 = arith.mulf %72, %75 : vector<8x64xf32>
    %77 = math.erf %76 : vector<8x64xf32>
    %cst_48 = arith.constant 1.000000e+00 : f32
    %78 = vector.broadcast %cst_48 : f32 to vector<8x64xf32>
    %79 = arith.addf %78, %77 : vector<8x64xf32>
    %80 = arith.mulf %74, %79 : vector<8x64xf32>
    %81 = arith.truncf %80 : vector<8x64xf32> to vector<8x64xbf16>
    %c0_49 = arith.constant 0 : index
    %c0_50 = arith.constant 0 : index
    %c0_51 = arith.constant 0 : index
    %82 = vector.load %arg11[%c0_49, %c0_50, %c0_51] : memref<2x64x32xbf16, #tpu.memory_space<vmem>>, vector<1x64x32xbf16>
    %83 = vector.shape_cast %82 : vector<1x64x32xbf16> to vector<64x32xbf16>
    %cst_52 = arith.constant dense<0.000000e+00> : vector<8x32xf32>
    %84 = tpu.matmul %81, %83, %cst_52 {dimension_numbers = #tpu.dot_dimension_numbers<[1], [0], [0], [1], [0, 0, 1, 1], [], []>} : vector<8x64xbf16>, vector<64x32xbf16>, vector<8x32xf32> -> vector<8x32xf32>
    %c0_53 = arith.constant 0 : index
    %c0_54 = arith.constant 0 : index
    %c0_55 = arith.constant 0 : index
    %85 = vector.load %arg12[%c0_53, %c0_54, %c0_55] : memref<2x1x32xf32, #tpu.memory_space<vmem>>, vector<1x1x32xf32>
    %86 = vector.shape_cast %85 : vector<1x1x32xf32> to vector<1x32xf32>
    %87 = vector.broadcast %86 : vector<1x32xf32> to vector<8x32xf32>
    %88 = arith.addf %84, %87 : vector<8x32xf32>
    %89 = arith.addf %88, %64 : vector<8x32xf32>
    %cst_56 = arith.constant dense<0.000000e+00> : vector<8xf32>
    %90 = vector.multi_reduction <add>, %89, %cst_56 [1] : vector<8x32xf32> to vector<8xf32>
    %91 = vector.shape_cast %90 : vector<8xf32> to vector<8x1xf32>
    %cst_57 = arith.constant 3.200000e+01 : f32
    %92 = vector.broadcast %cst_57 : f32 to vector<8x1xf32>
    %93 = arith.divf %91, %92 : vector<8x1xf32>
    %94 = vector.broadcast %93 : vector<8x1xf32> to vector<8x32xf32>
    %95 = arith.subf %89, %94 : vector<8x32xf32>
    %96 = arith.mulf %95, %95 : vector<8x32xf32>
    %cst_58 = arith.constant dense<0.000000e+00> : vector<8xf32>
    %97 = vector.multi_reduction <add>, %96, %cst_58 [1] : vector<8x32xf32> to vector<8xf32>
    %98 = vector.shape_cast %97 : vector<8xf32> to vector<8x1xf32>
    %cst_59 = arith.constant 3.200000e+01 : f32
    %99 = vector.broadcast %cst_59 : f32 to vector<8x1xf32>
    %100 = arith.divf %98, %99 : vector<8x1xf32>
    %cst_60 = arith.constant 9.99999974E-6 : f32
    %101 = vector.broadcast %cst_60 : f32 to vector<8x1xf32>
    %102 = arith.addf %100, %101 : vector<8x1xf32>
    %103 = math.rsqrt %102 : vector<8x1xf32>
    %104 = vector.broadcast %103 : vector<8x1xf32> to vector<8x32xf32>
    %105 = arith.mulf %95, %104 : vector<8x32xf32>
    %106 = vector.broadcast %2 : vector<1x32xf32> to vector<8x32xf32>
    %107 = arith.mulf %105, %106 : vector<8x32xf32>
    %108 = vector.broadcast %3 : vector<1x32xf32> to vector<8x32xf32>
    %109 = arith.addf %107, %108 : vector<8x32xf32>
    %110 = arith.truncf %109 : vector<8x32xf32> to vector<8x32xbf16>
    %111 = vector.shape_cast %110 : vector<8x32xbf16> to vector<1x8x32xbf16>
    %112 = vector.shape_cast %111 : vector<1x8x32xbf16> to vector<1x8x32xbf16>
    %113 = vector.broadcast %112 : vector<1x8x32xbf16> to vector<4x8x32xbf16>
    %c1 = arith.constant 1 : index
    %c0_61 = arith.constant 0 : index
    %c0_62 = arith.constant 0 : index
    %c0_63 = arith.constant 0 : index
    %114 = vector.load %arg2[%c1, %c0_61, %c0_62, %c0_63] : memref<2x4x32x8xbf16, #tpu.memory_space<vmem>>, vector<1x4x32x8xbf16>
    %115 = vector.shape_cast %114 : vector<1x4x32x8xbf16> to vector<4x32x8xbf16>
    "tpu.trace_start"() <{level = 10 : i32, message = "hnd,hdk->hnk"}> : () -> ()
    %cst_64 = arith.constant dense<0.000000e+00> : vector<4x8x8xf32>
    %116 = tpu.matmul %113, %115, %cst_64 {dimension_numbers = #tpu.dot_dimension_numbers<[2], [1], [1], [2], [0, 0, 0, 1, 1, 2], [0], [0]>} : vector<4x8x32xbf16>, vector<4x32x8xbf16>, vector<4x8x8xf32> -> vector<4x8x8xf32>
    "tpu.trace_stop"() : () -> ()
    %c1_65 = arith.constant 1 : index
    %c0_66 = arith.constant 0 : index
    %c0_67 = arith.constant 0 : index
    %c0_68 = arith.constant 0 : index
    %117 = vector.load %arg3[%c1_65, %c0_66, %c0_67, %c0_68] : memref<2x4x32x8xbf16, #tpu.memory_space<vmem>>, vector<1x4x32x8xbf16>
    %118 = vector.shape_cast %117 : vector<1x4x32x8xbf16> to vector<4x32x8xbf16>
    "tpu.trace_start"() <{level = 10 : i32, message = "hnd,hdk->hnk"}> : () -> ()
    %cst_69 = arith.constant dense<0.000000e+00> : vector<4x8x8xf32>
    %119 = tpu.matmul %113, %118, %cst_69 {dimension_numbers = #tpu.dot_dimension_numbers<[2], [1], [1], [2], [0, 0, 0, 1, 1, 2], [0], [0]>} : vector<4x8x32xbf16>, vector<4x32x8xbf16>, vector<4x8x8xf32> -> vector<4x8x8xf32>
    "tpu.trace_stop"() : () -> ()
    %c1_70 = arith.constant 1 : index
    %c0_71 = arith.constant 0 : index
    %c0_72 = arith.constant 0 : index
    %c0_73 = arith.constant 0 : index
    %120 = vector.load %arg4[%c1_70, %c0_71, %c0_72, %c0_73] : memref<2x4x32x8xbf16, #tpu.memory_space<vmem>>, vector<1x4x32x8xbf16>
    %121 = vector.shape_cast %120 : vector<1x4x32x8xbf16> to vector<4x32x8xbf16>
    "tpu.trace_start"() <{level = 10 : i32, message = "hnd,hdk->hnk"}> : () -> ()
    %cst_74 = arith.constant dense<0.000000e+00> : vector<4x8x8xf32>
    %122 = tpu.matmul %113, %121, %cst_74 {dimension_numbers = #tpu.dot_dimension_numbers<[2], [1], [1], [2], [0, 0, 0, 1, 1, 2], [0], [0]>} : vector<4x8x32xbf16>, vector<4x32x8xbf16>, vector<4x8x8xf32> -> vector<4x8x8xf32>
    "tpu.trace_stop"() : () -> ()
    %123 = arith.truncf %116 : vector<4x8x8xf32> to vector<4x8x8xbf16>
    %124 = arith.truncf %119 : vector<4x8x8xf32> to vector<4x8x8xbf16>
    "tpu.trace_start"() <{level = 10 : i32, message = "hnk,hmk->hnm"}> : () -> ()
    %cst_75 = arith.constant dense<0.000000e+00> : vector<4x8x8xf32>
    %125 = tpu.matmul %123, %124, %cst_75 {dimension_numbers = #tpu.dot_dimension_numbers<[2], [2], [1], [1], [0, 0, 0, 1, 1, 1], [0], [0]>} : vector<4x8x8xbf16>, vector<4x8x8xbf16>, vector<4x8x8xf32> -> vector<4x8x8xf32>
    "tpu.trace_stop"() : () -> ()
    %cst_76 = arith.constant 0.353553385 : f32
    %126 = vector.broadcast %cst_76 : f32 to vector<4x8x8xf32>
    %127 = arith.mulf %125, %126 : vector<4x8x8xf32>
    %cst_77 = arith.constant dense<0xFF800000> : vector<4x8xf32>
    %128 = vector.multi_reduction <maximumf>, %127, %cst_77 [2] : vector<4x8x8xf32> to vector<4x8xf32>
    %129 = vector.shape_cast %128 : vector<4x8xf32> to vector<4x8x1xf32>
    %130 = vector.broadcast %129 : vector<4x8x1xf32> to vector<4x8x8xf32>
    %131 = arith.subf %127, %130 : vector<4x8x8xf32>
    %132 = math.exp %131 : vector<4x8x8xf32>
    %cst_78 = arith.constant dense<0.000000e+00> : vector<4x8xf32>
    %133 = vector.multi_reduction <add>, %132, %cst_78 [2] : vector<4x8x8xf32> to vector<4x8xf32>
    %134 = vector.shape_cast %133 : vector<4x8xf32> to vector<4x8x1xf32>
    %135 = tpu.reciprocal %134 {approx = true} : vector<4x8x1xf32> -> vector<4x8x1xf32>
    %136 = vector.broadcast %135 : vector<4x8x1xf32> to vector<4x8x8xf32>
    %137 = arith.mulf %132, %136 : vector<4x8x8xf32>
    %138 = arith.truncf %137 : vector<4x8x8xf32> to vector<4x8x8xbf16>
    %139 = arith.truncf %122 : vector<4x8x8xf32> to vector<4x8x8xbf16>
    "tpu.trace_start"() <{level = 10 : i32, message = "hnm,hmk->hnk"}> : () -> ()
    %cst_79 = arith.constant dense<0.000000e+00> : vector<4x8x8xf32>
    %140 = tpu.matmul %138, %139, %cst_79 {dimension_numbers = #tpu.dot_dimension_numbers<[2], [1], [1], [2], [0, 0, 0, 1, 1, 2], [0], [0]>} : vector<4x8x8xbf16>, vector<4x8x8xbf16>, vector<4x8x8xf32> -> vector<4x8x8xf32>
    "tpu.trace_stop"() : () -> ()
    %141 = arith.truncf %140 : vector<4x8x8xf32> to vector<4x8x8xbf16>
    %c1_80 = arith.constant 1 : index
    %c0_81 = arith.constant 0 : index
    %c0_82 = arith.constant 0 : index
    %c0_83 = arith.constant 0 : index
    %142 = vector.load %arg5[%c1_80, %c0_81, %c0_82, %c0_83] : memref<2x4x8x32xbf16, #tpu.memory_space<vmem>>, vector<1x4x8x32xbf16>
    %143 = vector.shape_cast %142 : vector<1x4x8x32xbf16> to vector<4x8x32xbf16>
    "tpu.trace_start"() <{level = 10 : i32, message = "hnk,hkd->hnd"}> : () -> ()
    %cst_84 = arith.constant dense<0.000000e+00> : vector<4x8x32xf32>
    %144 = tpu.matmul %141, %143, %cst_84 {dimension_numbers = #tpu.dot_dimension_numbers<[2], [1], [1], [2], [0, 0, 0, 1, 1, 2], [0], [0]>} : vector<4x8x8xbf16>, vector<4x8x32xbf16>, vector<4x8x32xf32> -> vector<4x8x32xf32>
    "tpu.trace_stop"() : () -> ()
    %cst_85 = arith.constant dense<0.000000e+00> : vector<8x32xf32>
    %145 = vector.multi_reduction <add>, %144, %cst_85 [0] : vector<4x8x32xf32> to vector<8x32xf32>
    %c1_86 = arith.constant 1 : index
    %c0_87 = arith.constant 0 : index
    %c0_88 = arith.constant 0 : index
    %146 = vector.load %arg6[%c1_86, %c0_87, %c0_88] : memref<2x1x32xf32, #tpu.memory_space<vmem>>, vector<1x1x32xf32>
    %147 = vector.shape_cast %146 : vector<1x1x32xf32> to vector<1x32xf32>
    %148 = vector.broadcast %147 : vector<1x32xf32> to vector<8x32xf32>
    %149 = arith.addf %145, %148 : vector<8x32xf32>
    %150 = arith.addf %149, %109 : vector<8x32xf32>
    %cst_89 = arith.constant dense<0.000000e+00> : vector<8xf32>
    %151 = vector.multi_reduction <add>, %150, %cst_89 [1] : vector<8x32xf32> to vector<8xf32>
    %152 = vector.shape_cast %151 : vector<8xf32> to vector<8x1xf32>
    %cst_90 = arith.constant 3.200000e+01 : f32
    %153 = vector.broadcast %cst_90 : f32 to vector<8x1xf32>
    %154 = arith.divf %152, %153 : vector<8x1xf32>
    %155 = vector.broadcast %154 : vector<8x1xf32> to vector<8x32xf32>
    %156 = arith.subf %150, %155 : vector<8x32xf32>
    %157 = arith.mulf %156, %156 : vector<8x32xf32>
    %cst_91 = arith.constant dense<0.000000e+00> : vector<8xf32>
    %158 = vector.multi_reduction <add>, %157, %cst_91 [1] : vector<8x32xf32> to vector<8xf32>
    %159 = vector.shape_cast %158 : vector<8xf32> to vector<8x1xf32>
    %cst_92 = arith.constant 3.200000e+01 : f32
    %160 = vector.broadcast %cst_92 : f32 to vector<8x1xf32>
    %161 = arith.divf %159, %160 : vector<8x1xf32>
    %cst_93 = arith.constant 9.99999974E-6 : f32
    %162 = vector.broadcast %cst_93 : f32 to vector<8x1xf32>
    %163 = arith.addf %161, %162 : vector<8x1xf32>
    %164 = math.rsqrt %163 : vector<8x1xf32>
    %165 = vector.broadcast %164 : vector<8x1xf32> to vector<8x32xf32>
    %166 = arith.mulf %156, %165 : vector<8x32xf32>
    %167 = vector.broadcast %2 : vector<1x32xf32> to vector<8x32xf32>
    %168 = arith.mulf %166, %167 : vector<8x32xf32>
    %169 = vector.broadcast %3 : vector<1x32xf32> to vector<8x32xf32>
    %170 = arith.addf %168, %169 : vector<8x32xf32>
    %171 = arith.truncf %170 : vector<8x32xf32> to vector<8x32xbf16>
    %c1_94 = arith.constant 1 : index
    %c0_95 = arith.constant 0 : index
    %c0_96 = arith.constant 0 : index
    %172 = vector.load %arg9[%c1_94, %c0_95, %c0_96] : memref<2x32x64xbf16, #tpu.memory_space<vmem>>, vector<1x32x64xbf16>
    %173 = vector.shape_cast %172 : vector<1x32x64xbf16> to vector<32x64xbf16>
    %cst_97 = arith.constant dense<0.000000e+00> : vector<8x64xf32>
    %174 = tpu.matmul %171, %173, %cst_97 {dimension_numbers = #tpu.dot_dimension_numbers<[1], [0], [0], [1], [0, 0, 1, 1], [], []>} : vector<8x32xbf16>, vector<32x64xbf16>, vector<8x64xf32> -> vector<8x64xf32>
    %c1_98 = arith.constant 1 : index
    %c0_99 = arith.constant 0 : index
    %c0_100 = arith.constant 0 : index
    %175 = vector.load %arg10[%c1_98, %c0_99, %c0_100] : memref<2x1x64xf32, #tpu.memory_space<vmem>>, vector<1x1x64xf32>
    %176 = vector.shape_cast %175 : vector<1x1x64xf32> to vector<1x64xf32>
    %177 = vector.broadcast %176 : vector<1x64xf32> to vector<8x64xf32>
    %178 = arith.addf %174, %177 : vector<8x64xf32>
    %cst_101 = arith.constant 5.000000e-01 : f32
    %179 = vector.broadcast %cst_101 : f32 to vector<8x64xf32>
    %180 = arith.mulf %179, %178 : vector<8x64xf32>
    %cst_102 = arith.constant 0.707106769 : f32
    %181 = vector.broadcast %cst_102 : f32 to vector<8x64xf32>
    %182 = arith.mulf %178, %181 : vector<8x64xf32>
    %183 = math.erf %182 : vector<8x64xf32>
    %cst_103 = arith.constant 1.000000e+00 : f32
    %184 = vector.broadcast %cst_103 : f32 to vector<8x64xf32>
    %185 = arith.addf %184, %183 : vector<8x64xf32>
    %186 = arith.mulf %180, %185 : vector<8x64xf32>
    %187 = arith.truncf %186 : vector<8x64xf32> to vector<8x64xbf16>
    %c1_104 = arith.constant 1 : index
    %c0_105 = arith.constant 0 : index
    %c0_106 = arith.constant 0 : index
    %188 = vector.load %arg11[%c1_104, %c0_105, %c0_106] : memref<2x64x32xbf16, #tpu.memory_space<vmem>>, vector<1x64x32xbf16>
    %189 = vector.shape_cast %188 : vector<1x64x32xbf16> to vector<64x32xbf16>
    %cst_107 = arith.constant dense<0.000000e+00> : vector<8x32xf32>
    %190 = tpu.matmul %187, %189, %cst_107 {dimension_numbers = #tpu.dot_dimension_numbers<[1], [0], [0], [1], [0, 0, 1, 1], [], []>} : vector<8x64xbf16>, vector<64x32xbf16>, vector<8x32xf32> -> vector<8x32xf32>
    %c1_108 = arith.constant 1 : index
    %c0_109 = arith.constant 0 : index
    %c0_110 = arith.constant 0 : index
    %191 = vector.load %arg12[%c1_108, %c0_109, %c0_110] : memref<2x1x32xf32, #tpu.memory_space<vmem>>, vector<1x1x32xf32>
    %192 = vector.shape_cast %191 : vector<1x1x32xf32> to vector<1x32xf32>
    %193 = vector.broadcast %192 : vector<1x32xf32> to vector<8x32xf32>
    %194 = arith.addf %190, %193 : vector<8x32xf32>
    %195 = arith.addf %194, %170 : vector<8x32xf32>
    %cst_111 = arith.constant dense<0.000000e+00> : vector<8xf32>
    %196 = vector.multi_reduction <add>, %195, %cst_111 [1] : vector<8x32xf32> to vector<8xf32>
    %197 = vector.shape_cast %196 : vector<8xf32> to vector<8x1xf32>
    %cst_112 = arith.constant 3.200000e+01 : f32
    %198 = vector.broadcast %cst_112 : f32 to vector<8x1xf32>
    %199 = arith.divf %197, %198 : vector<8x1xf32>
    %200 = vector.broadcast %199 : vector<8x1xf32> to vector<8x32xf32>
    %201 = arith.subf %195, %200 : vector<8x32xf32>
    %202 = arith.mulf %201, %201 : vector<8x32xf32>
    %cst_113 = arith.constant dense<0.000000e+00> : vector<8xf32>
    %203 = vector.multi_reduction <add>, %202, %cst_113 [1] : vector<8x32xf32> to vector<8xf32>
    %204 = vector.shape_cast %203 : vector<8xf32> to vector<8x1xf32>
    %cst_114 = arith.constant 3.200000e+01 : f32
    %205 = vector.broadcast %cst_114 : f32 to vector<8x1xf32>
    %206 = arith.divf %204, %205 : vector<8x1xf32>
    %cst_115 = arith.constant 9.99999974E-6 : f32
    %207 = vector.broadcast %cst_115 : f32 to vector<8x1xf32>
    %208 = arith.addf %206, %207 : vector<8x1xf32>
    %209 = math.rsqrt %208 : vector<8x1xf32>
    %210 = vector.broadcast %209 : vector<8x1xf32> to vector<8x32xf32>
    %211 = arith.mulf %201, %210 : vector<8x32xf32>
    %212 = vector.broadcast %2 : vector<1x32xf32> to vector<8x32xf32>
    %213 = arith.mulf %211, %212 : vector<8x32xf32>
    %214 = vector.broadcast %3 : vector<1x32xf32> to vector<8x32xf32>
    %215 = arith.addf %213, %214 : vector<8x32xf32>
    %c0_116 = arith.constant 0 : index
    %c0_117 = arith.constant 0 : index
    %c0_118 = arith.constant 0 : index
    %216 = vector.load %arg13[%c0_116, %c0_117, %c0_118] : memref<1x8x32xf32, #tpu.memory_space<vmem>>, vector<1x8x32xf32>
    %217 = vector.shape_cast %216 : vector<1x8x32xf32> to vector<8x32xf32>
    %218 = vector.shape_cast %215 : vector<8x32xf32> to vector<1x8x32xf32>
    tpu.vector_store %arg13[%c0_116, %c0_117, %c0_118], %218 {strides = array<i32>} : memref<1x8x32xf32, #tpu.memory_space<vmem>>, vector<1x8x32xf32>,
    %c0_119 = arith.constant 0 : index
    %c0_120 = arith.constant 0 : index
    %c0_121 = arith.constant 0 : index
    %c0_122 = arith.constant 0 : index
    %219 = vector.load %arg14[%c0_119, %c0_120, %c0_121, %c0_122] : memref<1x4x8x8xf32, #tpu.memory_space<vmem>>, vector<1x4x8x8xf32>
    %220 = vector.shape_cast %219 : vector<1x4x8x8xf32> to vector<4x8x8xf32>
    %221 = vector.shape_cast %127 : vector<4x8x8xf32> to vector<1x4x8x8xf32>
    tpu.vector_store %arg14[%c0_119, %c0_120, %c0_121, %c0_122], %221 {strides = array<i32>} : memref<1x4x8x8xf32, #tpu.memory_space<vmem>>, vector<1x4x8x8xf32>,
    return
  }
  func.func @transform_0(%arg0: i32) -> (i32, i32, i32) {
    %c0_i32 = arith.constant 0 : i32
    %c0_i32_0 = arith.constant 0 : i32
    %c0_i32_1 = arith.constant 0 : i32
    return %arg0, %c0_i32, %c0_i32_0 : i32, i32, i32
  }
  func.func @transform_1(%arg0: i32) -> (i32, i32, i32, i32) {
    %c0_i32 = arith.constant 0 : i32
    %c0_i32_0 = arith.constant 0 : i32
    %c0_i32_1 = arith.constant 0 : i32
    %c0_i32_2 = arith.constant 0 : i32
    %c0_i32_3 = arith.constant 0 : i32
    return %c0_i32, %c0_i32_0, %c0_i32_1, %c0_i32_2 : i32, i32, i32, i32
  }
  func.func @transform_2(%arg0: i32) -> (i32, i32, i32, i32) {
    %c0_i32 = arith.constant 0 : i32
    %c0_i32_0 = arith.constant 0 : i32
    %c0_i32_1 = arith.constant 0 : i32
    %c0_i32_2 = arith.constant 0 : i32
    %c0_i32_3 = arith.constant 0 : i32
    return %c0_i32, %c0_i32_0, %c0_i32_1, %c0_i32_2 : i32, i32, i32, i32
  }
  func.func @transform_3(%arg0: i32) -> (i32, i32, i32, i32) {
    %c0_i32 = arith.constant 0 : i32
    %c0_i32_0 = arith.constant 0 : i32
    %c0_i32_1 = arith.constant 0 : i32
    %c0_i32_2 = arith.constant 0 : i32
    %c0_i32_3 = arith.constant 0 : i32
    return %c0_i32, %c0_i32_0, %c0_i32_1, %c0_i32_2 : i32, i32, i32, i32
  }
  func.func @transform_4(%arg0: i32) -> (i32, i32, i32, i32) {
    %c0_i32 = arith.constant 0 : i32
    %c0_i32_0 = arith.constant 0 : i32
    %c0_i32_1 = arith.constant 0 : i32
    %c0_i32_2 = arith.constant 0 : i32
    %c0_i32_3 = arith.constant 0 : i32
    return %c0_i32, %c0_i32_0, %c0_i32_1, %c0_i32_2 : i32, i32, i32, i32
  }
  func.func @transform_5(%arg0: i32) -> (i32, i32, i32) {
    %c0_i32 = arith.constant 0 : i32
    %c0_i32_0 = arith.constant 0 : i32
    %c0_i32_1 = arith.constant 0 : i32
    %c0_i32_2 = arith.constant 0 : i32
    return %c0_i32, %c0_i32_0, %c0_i32_1 : i32, i32, i32
  }
  func.func @transform_6(%arg0: i32) -> (i32, i32) {
    %c0_i32 = arith.constant 0 : i32
    %c0_i32_0 = arith.constant 0 : i32
    %c0_i32_1 = arith.constant 0 : i32
    return %c0_i32, %c0_i32_0 : i32, i32
  }
  func.func @transform_7(%arg0: i32) -> (i32, i32) {
    %c0_i32 = arith.constant 0 : i32
    %c0_i32_0 = arith.constant 0 : i32
    %c0_i32_1 = arith.constant 0 : i32
    return %c0_i32, %c0_i32_0 : i32, i32
  }
  func.func @transform_8(%arg0: i32) -> (i32, i32, i32) {
    %c0_i32 = arith.constant 0 : i32
    %c0_i32_0 = arith.constant 0 : i32
    %c0_i32_1 = arith.constant 0 : i32
    %c0_i32_2 = arith.constant 0 : i32
    return %c0_i32, %c0_i32_0, %c0_i32_1 : i32, i32, i32
  }
  func.func @transform_9(%arg0: i32) -> (i32, i32, i32) {
    %c0_i32 = arith.constant 0 : i32
    %c0_i32_0 = arith.constant 0 : i32
    %c0_i32_1 = arith.constant 0 : i32
    %c0_i32_2 = arith.constant 0 : i32
    return %c0_i32, %c0_i32_0, %c0_i32_1 : i32, i32, i32
  }
  func.func @transform_10(%arg0: i32) -> (i32, i32, i32) {
    %c0_i32 = arith.constant 0 : i32
    %c0_i32_0 = arith.constant 0 : i32
    %c0_i32_1 = arith.constant 0 : i32
    %c0_i32_2 = arith.constant 0 : i32
    return %c0_i32, %c0_i32_0, %c0_i32_1 : i32, i32, i32
  }
  func.func @transform_11(%arg0: i32) -> (i32, i32, i32) {
    %c0_i32 = arith.constant 0 : i32
    %c0_i32_0 = arith.constant 0 : i32
    %c0_i32_1 = arith.constant 0 : i32
    %c0_i32_2 = arith.constant 0 : i32
    return %c0_i32, %c0_i32_0, %c0_i32_1 : i32, i32, i32
  }
  func.func @transform_12(%arg0: i32) -> (i32, i32, i32) {
    %c0_i32 = arith.constant 0 : i32
    %c0_i32_0 = arith.constant 0 : i32
    %c0_i32_1 = arith.constant 0 : i32
    return %arg0, %c0_i32, %c0_i32_0 : i32, i32, i32
  }
  func.func @transform_13(%arg0: i32) -> (i32, i32, i32, i32) {
    %c0_i32 = arith.constant 0 : i32
    %c0_i32_0 = arith.constant 0 : i32
    %c0_i32_1 = arith.constant 0 : i32
    %c0_i32_2 = arith.constant 0 : i32
    return %arg0, %c0_i32, %c0_i32_0, %c0_i32_1 : i32, i32, i32, i32
  }
}

</mosaic_0001>

<bundles_post_ra>
// kernel: tpu_custom_call.1
= control target key start
LH: loop header
LB: loop body
LE: loop exit
PB: predicated region body
PF: predicated region fallthrough
CT: control target
= control target key end

     0   :  { %s3509_s0 = inlined_call_operand.vmem [shape: f32[2,8,32], index: 0, kind: input, shape index: {}]   ;;  %s3510_s1 = inlined_call_operand.vmem [shape: bf16[2,4,32,8], index: 1, kind: input, shape index: {}]   ;;  %s3511_s2 = inlined_call_operand.vmem [shape: bf16[2,4,32,8], index: 2, kind: input, shape index: {}]   ;;  %s3512_s3 = inlined_call_operand.vmem [shape: bf16[2,4,32,8], index: 3, kind: input, shape index: {}]   ;;  %s3513_s4 = inlined_call_operand.vmem [shape: bf16[2,4,8,32], index: 4, kind: input, shape index: {}]   ;;  %s3514_s5 = inlined_call_operand.vmem [shape: f32[2,1,32], index: 5, kind: input, shape index: {}]   ;;  %s3515_s6 = inlined_call_operand.vmem [shape: f32[1,32], index: 6, kind: input, shape index: {}]   ;;  %s3516_s7 = inlined_call_operand.vmem [shape: f32[1,32], index: 7, kind: input, shape index: {}]   ;;  %s3517_s8 = inlined_call_operand.vmem [shape: bf16[2,32,64], index: 8, kind: input, shape index: {}]   ;;  %s3518_s9 = inlined_call_operand.vmem [shape: f32[2,1,64], index: 9, kind: input, shape index: {}]   ;;  %s3519_s10 = inlined_call_operand.vmem [shape: bf16[2,64,32], index: 10, kind: input, shape index: {}]   ;;  %s3520_s11 = inlined_call_operand.vmem [shape: f32[2,1,32], index: 11, kind: input, shape index: {}]   ;;  %s3521_s12 = inlined_call_operand.hbm [shape: f32[2,8,32], index: 12, kind: output, shape index: {0}]   ;;  %s3522_s13 = inlined_call_operand.hbm [shape: f32[2,4,8,8], index: 13, kind: output, shape index: {1}]  }
   0x1   :  { %3529 = sst [smem:[#allocation14_spill]] %s3509_s0 }
   0x2   :  { %19 = vsyncpa [#allocation3], 0 }
   0x3   :  { %21 = vsyncpa [#allocation3 + $0x1], 0 }
   0x4   :  { %22 = vsyncpa [#allocation5], 0 }
   0x5   :  { %24 = vsyncpa [#allocation5 + $0x1], 0  ;;  %s3014_s25 = smov 0   ;;  %s3016_s26 = smov 0  }
   0x6   :  { %s3018_s27 = smov 0   ;;  %s3020_s28 = smov 0  }
   0x7 LB: > { %3530 = sst [smem:[#allocation8_spill]] %s2927_s25  ;;  %s3035_s29 = sadd.s32 4294967295, %s2939_s28   ;;  %s2939_s28 = sphi %s3020_s28, %s3542_s28   ;;  %s2935_s27 = sphi %s3018_s27, %s3544_s27   ;;  %s2931_s26 = sphi %s3016_s26, %s3546_s26   ;;  %s2927_s25 = sphi %s3014_s25, %s3545_s25  }
   0x8   : > { %3531 = sst [smem:[#allocation9_spill]] %s2935_s27  ;;  %s2308_s30 = sadd.s32 4294967294, %s2939_s28  }
   0x9   : > { %3532 = sst [smem:[#allocation10_spill]] %s2939_s28  ;;  %s3039_s14 = sadd.s32 1, %s2939_s28  }
   0xa   : > { %3533 = sst [smem:[#allocation11_spill]] %s3039_s14  ;;  %s294_s15 = sadd.s32 1, %s2935_s27 }
   0xb   : > { %s291_s16 = ssub.s32 %s2939_s28, %s3039_s14  ;;  %p304_p0 = scmp.ne.s32.totalorder %s2935_s27, %s2931_s26 }
   0xc   : > { %p292_p1 = scmp.eq.s32.totalorder %s291_s16, 0  ;;  %p305_p2 = scmp.eq.s32.totalorder %s3035_s29, 1 }
   0xd   : > { %p310_p3 = scmp.ne.s32.totalorder %s2931_s26, %s2927_s25  ;;  %p311_p4 = scmp.eq.s32.totalorder %s2308_s30, 1 }
   0xe   : > { %s3050_s17 = scalar_select %p292_p1, %s2935_s27, %s294_s15  }
   0xf   : > { %p3052_p5 = por %p305_p2, %p304_p0  ;;  %p3056_p6 = por %p311_p4, %p310_p3 }
  0x10   : > { %3534 = sst [smem:[#allocation12_spill]] %s3050_s17  ;;  %p2311_p7 = scmp.ge.s32.totalorder %s2939_s28, 1 }
  0x11   : > { %s3536_s19 = scalar_select %p3056_p6, 1, 0 }
  0x12   : > { %p395_p8 = scmp.lt.s32.totalorder %s2939_s28, 3 }
  0x13   : > { %3537 = sst [smem:[#allocation13_spill]] %s3536_s19 }
  0x14   : > { %p396_p9 = pnand %p2311_p7, %p395_p8 }
  0x15   : > { %p443_p10 = scmp.lt.s32.totalorder (!%p396_p9), %s3035_s29, 1  ;;  %s3538_s0 = sld [smem:[#allocation14_spill]] (!%p396_p9) }
  0x16   : > { %399 = sbr.rel (%p396_p9) target bundleno = 3407 (0xd4f), region = 68  ;;  %s2743_s27 = sshll.u32 (!%p396_p9), %s3035_s29, 5 }
  0x17   : > { %s2209_s30 = scalar_lea.hbm (!%p396_p9), %s3522_s13, %s2743_s27  ;;  %s2865_s20 = scalar_lea.hbm (!%p396_p9), %s3522_s13, 64 }
  0x18   : > { %s2212_s14 = sshll.u32 (!%p396_p9), %s2209_s30, 4  ;;  %s2213_s14 = int_to_ptr.hbm [resolvable:$true] %s2212_s14 }
  0x19   : > { %s2859_s28 = sshra.s32 (!%p396_p9), %s2213_s14, 4  ;;  %s2860_s28 = int_to_ptr.hbm [resolvable:$true] %s2859_s28 }
  0x1a   : > { %p2866_p0 = scmp.lt.s32.totalorder (!%p396_p9), %s2860_s28, %s3522_s13 }
  0x1b   : > { %v2684_v0 = vld [vmem:[%s3510_s1 + $0x8] sm:$0xff]  ;;  %v2686_v1 = vld [vmem:[%s3510_s1 + $0x18] sm:$0xff]  ;;  %v2683_v4 = vld [vmem:[%s3510_s1] sm:$0xff]  ;;  %s444_s22 = scalar_select %p443_p10, %s3035_s29, 1  ;;  %vm480_vm0 = vcmask 261120   ;;  %vm812_vm1 = vcmask 64512  }
  0x1c   : > { %v2688_v2 = vld [vmem:[%s3510_s1 + $0x28] sm:$0xff]  ;;  %v2690_v3 = vld [vmem:[%s3510_s1 + $0x38] sm:$0xff]  ;;  %490 = vmatpush.bf16.msra.mxu0 %v2684_v0  ;;  %515 = vmatpush.bf16.msra.mxu1 %v2686_v1  ;;  %v2685_v5 = vld [vmem:[%s3510_s1 + $0x10] sm:$0xff]  ;;  %vm948_vm2 = vcmask 1043456   ;;  %vm1274_vm11 = vcmask 523264  }
  0x1d   : > { %540 = vmatpush.bf16.msra.mxu2 %v2688_v2  ;;  %565 = vmatpush.bf16.msra.mxu3 %v2690_v3  ;;  %v2687_v6 = vld [vmem:[%s3510_s1 + $0x20] sm:$0xff]  ;;  %v2689_v7 = vld [vmem:[%s3510_s1 + $0x30] sm:$0xff]  ;;  %s2314_s16 = sshll.u32 %s444_s22, 3  ;;  %v2692_v8 = vld [vmem:[%s3511_s2 + $0x8] sm:$0xff]  ;;  %s2861_s22 = scalar_lea.hbm %s2860_s28, 32 }
  0x1e   : > { %v2694_v9 = vld [vmem:[%s3511_s2 + $0x18] sm:$0xff]  ;;  %s446_s25 = scalar_lea.vmem %s3538_s0, %s2314_s16  ;;  %v2696_v10 = vld [vmem:[%s3511_s2 + $0x28] sm:$0xff]  ;;  %v2691_v14 = vld [vmem:[%s3511_s2] sm:$0xff]  ;;  %p2862_p11 = scmp.ne.s32.totalorder %s2860_s28, %s2861_s22 }
  0x1f   : > { %v2698_v11 = vld [vmem:[%s3511_s2 + $0x38] sm:$0xff]  ;;  %v3103_v12 = vld [vmem:[%s446_s25] sm:$0xff]  ;;  %v2693_v15 = vld [vmem:[%s3511_s2 + $0x10] sm:$0xff]  ;;  %s3363_s25 = sand.u32 1, %s2931_s26   ;;  %p2867_p1 = scmp.lt.s32.totalorder %s2865_s20, %s2861_s22 }
  0x20   : > { %491 = vmatpush.bf16.msra.mxu0 %v2683_v4  ;;  %516 = vmatpush.bf16.msra.mxu1 %v2685_v5  ;;  %v451_v13 = vpack.c.bf16 %v3103_v12, %v3103_v12  ;;  %v2695_v16 = vld [vmem:[%s3511_s2 + $0x20] sm:$0xff]  ;;  %v2697_v17 = vld [vmem:[%s3511_s2 + $0x30] sm:$0xff]  ;;  %v2704_v18 = vld [vmem:[%s3512_s3 + $0x28] sm:$0xff]  ;;  %s2313_s15 = sshll.u32 %s3363_s25, 5  ;;  %s2184_s19 = scalar_lea.sflag [#allocation5], %s3363_s25 }
  0x21   : > { %541 = vmatpush.bf16.msra.mxu2 %v2687_v6  ;;  %566 = vmatpush.bf16.msra.mxu3 %v2689_v7  ;;  %v2700_v19 = vld [vmem:[%s3512_s3 + $0x8] sm:$0xff]  ;;  %v2702_v20 = vld [vmem:[%s3512_s3 + $0x18] sm:$0xff]  ;;  %v2703_v21 = vld [vmem:[%s3512_s3 + $0x20] sm:$0xff]  ;;  %s3366_s16 = scalar_lea.vmem [#allocation4], %s2313_s15  ;;  %p2863_p12 = pnand %p2862_p11, %p3052_p5 }
  0x22   : > { %v2699_v22 = vld [vmem:[%s3512_s3] sm:$0xff]  ;;  %v2701_v23 = vld [vmem:[%s3512_s3 + $0x10] sm:$0xff]  ;;  %v2706_v24 = vld [vmem:[%s3512_s3 + $0x38] sm:$0xff]  ;;  %s2210_s21 = sshll.u32 %s3366_s16, 4  ;;  %p2868_p2 = por %p2867_p1, %p2866_p0  ;;  %s2211_s21 = int_to_ptr.vmem [resolvable:$true] %s2210_s21 }
  0x23   : > { %2323 = vmatmul.msk.bf16.vlgmr.msra.gmra.mxu0 %vm480_vm0, %v451_v13  ;;  %2332 = vmatmul.msk.bf16.vlgmr.msra.gmra.mxu1 %vm480_vm0, %v451_v13  ;;  %v2705_v25 = vld [vmem:[%s3512_s3 + $0x30] sm:$0xff]  ;;  %p2864_p13 = pneg %p2863_p12 }
  0x24   : > { %606 = vmatpush.bf16.msrb.mxu0 %v2692_v8  ;;  %631 = vmatpush.bf16.msrb.mxu1 %v2694_v9 }
  0x25   : > { %2341 = vmatmul.msk.bf16.vlgmr.msra.gmra.mxu2 %vm480_vm0, %v451_v13  ;;  %2350 = vmatmul.msk.bf16.vlgmr.msra.gmra.mxu3 %vm480_vm0, %v451_v13  ;;  %p2869_p3 = pnand %p2868_p2, %p2864_p13 }
  0x26   : > { %656 = vmatpush.bf16.msrb.mxu2 %v2696_v10  ;;  %681 = vmatpush.bf16.msrb.mxu3 %v2698_v11 }
  0x28   : > { %607 = vmatpush.bf16.msrb.mxu0 %v2691_v14  ;;  %632 = vmatpush.bf16.msrb.mxu1 %v2693_v15 }
  0x2a   : > { %657 = vmatpush.bf16.msrb.mxu2 %v2695_v16  ;;  %682 = vmatpush.bf16.msrb.mxu3 %v2697_v17 }
  0x2c   : > { %722 = vmatpush.bf16.msra.mxu0 %v2700_v19  ;;  %747 = vmatpush.bf16.msra.mxu1 %v2702_v20 }
  0x2e   : > { %772 = vmatpush.bf16.msra.mxu2 %v2704_v18  ;;  %797 = vmatpush.bf16.msra.mxu3 %v2706_v24 }
  0x30   : > { %723 = vmatpush.bf16.msra.mxu0 %v2699_v22  ;;  %748 = vmatpush.bf16.msra.mxu1 %v2701_v23 }
  0x32   : > { %773 = vmatpush.bf16.msra.mxu2 %v2703_v21  ;;  %798 = vmatpush.bf16.msra.mxu3 %v2705_v25 }
  0x33   : > { %2359 = vmatmul.msk.bf16.vlgmr.msrb.gmra.mxu0 %vm480_vm0, %v451_v13  ;;  %2368 = vmatmul.msk.bf16.vlgmr.msrb.gmra.mxu1 %vm480_vm0, %v451_v13 }
  0x35   : > { %2377 = vmatmul.msk.bf16.vlgmr.msrb.gmra.mxu2 %vm480_vm0, %v451_v13  ;;  %2386 = vmatmul.msk.bf16.vlgmr.msrb.gmra.mxu3 %vm480_vm0, %v451_v13 }
  0x43   : > { %2395 = vmatmul.msk.bf16.vlgmr.msra.gmra.mxu0 %vm480_vm0, %v451_v13  ;;  %2404 = vmatmul.msk.bf16.vlgmr.msra.gmra.mxu1 %vm480_vm0, %v451_v13 }
  0x45   : > { %2413 = vmatmul.msk.bf16.vlgmr.msra.gmra.mxu2 %vm480_vm0, %v451_v13  ;;  %2422 = vmatmul.msk.bf16.vlgmr.msra.gmra.mxu3 %vm480_vm0, %v451_v13 }
  0xa0   : > { %v493_v26 = vpop.f32.mrf.mxu0  ;;  %v518_v27 = vpop.f32.mrf.mxu1 }
  0xa1   : > { %v805_v42 = vpack.c.bf16 %v518_v27, %v518_v27  ;;  %v804_v47 = vpack.c.bf16 %v493_v26, %v493_v26 }
  0xa8   : > { %v543_v28 = vpop.f32.mrf.mxu2  ;;  %v568_v29 = vpop.f32.mrf.mxu3 }
  0xa9   : > { %v495_v30 = vpop.f32.mrf.mxu0  ;;  %v520_v31 = vpop.f32.mrf.mxu1  ;;  %v806_v52 = vpack.c.bf16 %v543_v28, %v543_v28  ;;  %v807_v53 = vpack.c.bf16 %v568_v29, %v568_v29 }
  0xb0   : > { %v545_v32 = vpop.f32.mrf.mxu2  ;;  %v570_v33 = vpop.f32.mrf.mxu3 }
  0xb1   : > { %v609_v34 = vpop.f32.mrf.mxu0  ;;  %v634_v35 = vpop.f32.mrf.mxu1 }
  0xb2   : > { %v808_v36 = vpack.c.bf16 %v609_v34, %v609_v34  ;;  %v809_v37 = vpack.c.bf16 %v634_v35, %v634_v35 }
  0xb4   : > { %v817_v38 = vsel %vm812_vm1, %v808_v36, 0  ;;  %v836_v39 = vsel %vm812_vm1, %v809_v37, 0 }
  0xb5   : > { %826 = vmatpush.bf16.xpose.msrb.mxu0 %v817_v38  ;;  %845 = vmatpush.bf16.xpose.msrb.mxu1 %v836_v39 }
  0xb8   : > { %v659_v40 = vpop.f32.mrf.mxu2  ;;  %v684_v41 = vpop.f32.mrf.mxu3 }
  0xb9   : > { %v810_v43 = vpack.c.bf16 %v659_v40, %v659_v40  ;;  %v811_v44 = vpack.c.bf16 %v684_v41, %v684_v41  ;;  %v611_v45 = vpop.f32.mrf.mxu0  ;;  %v636_v46 = vpop.f32.mrf.mxu1 }
  0xbb   : > { %v855_v48 = vsel %vm812_vm1, %v810_v43, 0  ;;  %v874_v49 = vsel %vm812_vm1, %v811_v44, 0 }
  0xbc   : > { %864 = vmatpush.bf16.xpose.msrb.mxu2 %v855_v48  ;;  %883 = vmatpush.bf16.xpose.msrb.mxu3 %v874_v49 }
  0xbd   : > { %2423 = vmatmul.msk.bf16.vlgmr.msrb.gmra.mxu0 %vm812_vm1, %v804_v47  ;;  %2424 = vmatmul.msk.bf16.vlgmr.msrb.gmra.mxu1 %vm812_vm1, %v805_v42 }
  0xc0   : > { %v661_v50 = vpop.f32.mrf.mxu2  ;;  %v686_v51 = vpop.f32.mrf.mxu3 }
  0xc1   : > { %v725_v54 = vpop.f32.mrf.mxu0  ;;  %v750_v55 = vpop.f32.mrf.mxu1 }
  0xc2   : > { %v941_v56 = vpack.c.bf16 %v725_v54, %v725_v54  ;;  %v942_v57 = vpack.c.bf16 %v750_v55, %v750_v55 }
  0xc3   : > { %2425 = vmatmul.msk.bf16.vlgmr.msrb.gmra.mxu2 %vm812_vm1, %v806_v52  ;;  %2426 = vmatmul.msk.bf16.vlgmr.msrb.gmra.mxu3 %vm812_vm1, %v807_v53 }
  0xc4   : > { %v950_v58 = vsel %vm948_vm2, %v941_v56, 0  ;;  %v969_v59 = vsel %vm948_vm2, %v942_v57, 0 }
  0xc5   : > { %959 = vmatpush.bf16.msra.mxu0 %v950_v58  ;;  %978 = vmatpush.bf16.msra.mxu1 %v969_v59  ;;  %v1026_v59 = vld [vmem:[%s3513_s4] sm:$0xf] }
  0xc8   : > { %v775_v60 = vpop.f32.mrf.mxu2  ;;  %v800_v2 = vpop.f32.mrf.mxu3 }
  0xc9   : > { %v943_v61 = vpack.c.bf16 %v775_v60, %v775_v60  ;;  %v727_v63 = vpop.f32.mrf.mxu0  ;;  %v752_v0 = vpop.f32.mrf.mxu1  ;;  %v944_v3 = vpack.c.bf16 %v800_v2, %v800_v2  ;;  %v1034_v60 = vsel %vm948_vm2, %v1026_v59, 0  ;;  %v3227_v59 = vld [vmem:[%s3516_s7] ss:$0 sm:$0xff] }
  0xca   : > { %1043 = vmatpush.bf16.msrb.mxu0 %v1034_v60  ;;  %v1028_v63 = vld [vmem:[%s3513_s4 + $0x8] sm:$0xf] }
  0xcb   : > { %v988_v62 = vsel %vm948_vm2, %v943_v61, 0  ;;  %v1007_v4 = vsel %vm948_vm2, %v944_v3, 0  ;;  %v1027_v61 = vld [vmem:[%s3513_s4 + $0x4] sm:$0xf]  ;;  %v1072_v0 = vsel %vm948_vm2, %v1028_v63, 0 }
  0xcc   : > { %997 = vmatpush.bf16.msra.mxu2 %v988_v62  ;;  %1016 = vmatpush.bf16.msra.mxu3 %v1007_v4  ;;  %v1053_v62 = vsel %vm948_vm2, %v1027_v61, 0 }
  0xcd   : > { %1062 = vmatpush.bf16.msrb.mxu1 %v1053_v62 }
  0xd0   : > { %v777_v1 = vpop.f32.mrf.mxu2  ;;  %v802_v5 = vpop.f32.mrf.mxu3  ;;  %1081 = vmatpush.bf16.msrb.mxu2 %v1072_v0  ;;  %v2794_v0 = vld [vmem:[%s3518_s9] ss:$0 sm:$0xff] }
  0xd1   : > { %v1029_v1 = vld [vmem:[%s3513_s4 + $0xc] sm:$0xf] }
  0xd2   : > { %v1091_v2 = vsel %vm948_vm2, %v1029_v1, 0 }
  0xd3   : > { %1100 = vmatpush.bf16.msrb.mxu3 %v1091_v2 }
 0x13a   : > { %v828_v6 = vpop.f32.mrf.mxu0  ;;  %v847_v7 = vpop.f32.mrf.mxu1 }
 0x13b   : > { %v889_v8 = vmul.f32 0.35355338, %v828_v6  ;;  %v890_v10 = vmul.f32 0.35355338, %v847_v7 }
 0x13d   : > { %v893_v9 = vsel %vm812_vm1, %v889_v8, -inf  ;;  %v896_v14 = vsel %vm812_vm1, %v890_v10, -inf }
 0x13e   : > { %894 = vmax.xlane.f32.xlu1 %v893_v9 }
 0x142   : > { %v830_v11 = vpop.f32.mrf.mxu0  ;;  %v849_v13 = vpop.f32.mrf.mxu1 }
 0x146   : > { %v866_v15 = vpop.f32.mrf.mxu2  ;;  %v885_v16 = vpop.f32.mrf.mxu3  ;;  %897 = vmax.xlane.f32.xlu1 %v896_v14 }
 0x147   : > { %v891_v17 = vmul.f32 0.35355338, %v866_v15  ;;  %v892_v19 = vmul.f32 0.35355338, %v885_v16 }
 0x149   : > { %v899_v18 = vsel %vm812_vm1, %v891_v17, -inf  ;;  %v902_v22 = vsel %vm812_vm1, %v892_v19, -inf }
 0x14a   : > { %900 = vmax.xlane.f32.xlu0 %v899_v18 }
 0x14e   : > { %v868_v20 = vpop.f32.mrf.mxu2  ;;  %v887_v21 = vpop.f32.mrf.mxu3 }
 0x152   : > { %903 = vmax.xlane.f32.xlu0 %v902_v22 }
 0x1b1   : > { %v895_v23 = vpop.xlane.xlu1 %894 }
 0x1b2   : > { %v905_v24 = vsub.f32 %v889_v8, %v895_v23 }
 0x1b4   : > { %v909_v25 = vmul.f32 1.442695, %v905_v24 }
 0x1b6   : > { %2799 = vpow2.f32 %v909_v25 }
 0x1b9   : > { %v898_v26 = vpop.xlane.xlu1 %897 }
 0x1ba   : > { %v906_v27 = vsub.f32 %v890_v10, %v898_v26 }
 0x1bc   : > { %v2800_v28 = vpop.eup %2799  ;;  %v911_v29 = vmul.f32 1.442695, %v906_v27 }
 0x1bd   : > { %v901_v30 = vpop.xlane.xlu0 %900  ;;  %v917_v31 = vsel %vm812_vm1, %v2800_v28, 0.0 }
 0x1be   : > { %2801 = vpow2.f32 %v911_v29  ;;  %v907_v32 = vsub.f32 %v891_v17, %v901_v30  ;;  %918 = vadd.xlane.f32.xlu0 %v917_v31 }
 0x1c0   : > { %v913_v33 = vmul.f32 1.442695, %v907_v32 }
 0x1c2   : > { %2803 = vpow2.f32 %v913_v33 }
 0x1c4   : > { %v2802_v34 = vpop.eup %2801 }
 0x1c5   : > { %v904_v35 = vpop.xlane.xlu0 %903  ;;  %v920_v36 = vsel %vm812_vm1, %v2802_v34, 0.0 }
 0x1c6   : > { %v908_v37 = vsub.f32 %v892_v19, %v904_v35  ;;  %921 = vadd.xlane.f32.xlu1 %v920_v36  ;;  %v2941_v35 = vmov 32.0  }
 0x1c8   : > { %v2804_v38 = vpop.eup %2803  ;;  %v915_v39 = vmul.f32 1.442695, %v908_v37 }
 0x1c9   : > { %v923_v40 = vsel %vm812_vm1, %v2804_v38, 0.0 }
 0x1ca   : > { %2805 = vpow2.f32 %v915_v39  ;;  %924 = vadd.xlane.f32.xlu2 %v923_v40 }
 0x1d0   : > { %v2806_v41 = vpop.eup %2805 }
 0x1d1   : > { %v926_v42 = vsel %vm812_vm1, %v2806_v41, 0.0 }
 0x1d2   : > { %927 = vadd.xlane.f32.xlu2 %v926_v42 }
 0x231   : > { %v919_v43 = vpop.xlane.xlu0 %918 }
 0x232   : > { %2807 = vrcp.f32 %v919_v43 }
 0x238   : > { %v2808_v44 = vpop.eup %2807 }
 0x239   : > { %v933_v45 = vmul.f32 %v2808_v44, %v2800_v28  ;;  %v922_v46 = vpop.xlane.xlu1 %921  ;;  %v2791_v28 = vld [vmem:[%s3514_s5] ss:$0 sm:$0xff] }
 0x23a   : > { %2809 = vrcp.f32 %v922_v46  ;;  %v2708_v46 = vld [vmem:[%s3517_s8 + $0x8] sm:$0xff] }
 0x23b   : > { %v937_v47 = vpack.c.bf16 %v933_v45, %v933_v45 }
 0x23d   : > { %v925_v48 = vpop.xlane.xlu2 %924  ;;  %2427 = vmatmul.msk.bf16.vlgmr.msra.gmra.mxu0 %vm812_vm1, %v937_v47  ;;  %v2707_v47 = vld [vmem:[%s3517_s8] sm:$0xff] }
 0x23e   : > { %2811 = vrcp.f32 %v925_v48  ;;  %1186 = vmatpush.bf16.msra.mxu0 %v2708_v46 }
 0x240   : > { %v2810_v49 = vpop.eup %2809 }
 0x241   : > { %v934_v50 = vmul.f32 %v2810_v49, %v2802_v34 }
 0x242   : > { %1187 = vmatpush.bf16.msra.mxu0 %v2707_v47 }
 0x243   : > { %v938_v51 = vpack.c.bf16 %v934_v50, %v934_v50 }
 0x244   : > { %v2812_v52 = vpop.eup %2811 }
 0x245   : > { %v935_v53 = vmul.f32 %v2812_v52, %v2804_v38  ;;  %v928_v54 = vpop.xlane.xlu2 %927  ;;  %2428 = vmatmul.msk.bf16.vlgmr.msra.gmra.mxu1 %vm812_vm1, %v938_v51 }
 0x246   : > { %2813 = vrcp.f32 %v928_v54 }
 0x247   : > { %v939_v55 = vpack.c.bf16 %v935_v53, %v935_v53  ;;  %2815 = vrcp.f32 %v2941_v35 }
 0x249   : > { %2429 = vmatmul.msk.bf16.vlgmr.msra.gmra.mxu2 %vm812_vm1, %v939_v55 }
 0x24c   : > { %v2814_v56 = vpop.eup %2813 }
 0x24d   : > { %v936_v57 = vmul.f32 %v2814_v56, %v2806_v41  ;;  %v2816_v36 = vpop.eup %2815 }
 0x24e   : > { %v1123_v37 = vmul.f32 32.0, %v2816_v36  ;;  %vm1127_vm3 = vweird.f32 %v2816_v36 }
 0x24f   : > { %v940_v58 = vpack.c.bf16 %v936_v57, %v936_v57  ;;  %v3222_v57 = vld [vmem:[%s3515_s6] ss:$0 sm:$0xff] }
 0x250   : > { %v1124_v38 = vsub.f32 1.0, %v1123_v37 }
 0x251   : > { %2430 = vmatmul.msk.bf16.vlgmr.msra.gmra.mxu3 %vm812_vm1, %v940_v58 }
 0x252   : > { %v1125_v39 = vmul.f32 %v2816_v36, %v1124_v38 }
 0x254   : > { %v1126_v40 = vadd.f32 %v2816_v36, %v1125_v39 }
 0x256   : > { %v3208_v41 = vsel %vm1127_vm3, %v2816_v36, %v1126_v40 }
 0x2ba   : > { %v961_v3 = vpop.f32.mrf.mxu0 }
 0x2bb   : > { %v1022_v4 = vpack.c.bf16 %v961_v3, %v961_v3 }
 0x2bd   : > { %2431 = vmatmul.msk.bf16.vlgmr.msrb.gmra.mxu0 %vm812_vm1, %v1022_v4 }
 0x2c2   : > { %v963_v5 = vpop.f32.mrf.mxu0  ;;  %v980_v6 = vpop.f32.mrf.mxu1 }
 0x2c3   : > { %v1023_v7 = vpack.c.bf16 %v980_v6, %v980_v6 }
 0x2c5   : > { %2432 = vmatmul.msk.bf16.vlgmr.msrb.gmra.mxu1 %vm812_vm1, %v1023_v7  ;;  %v2712_v7 = vld [vmem:[%s3519_s10 + $0x18] sm:$0xff] }
 0x2c6   : > { %1282 = vmatpush.bf16.msra.mxu1 %v2712_v7  ;;  %v2722_v7 = vld [vmem:[%s3511_s2 + $0x48] sm:$0xff] }
 0x2ca   : > { %v982_v8 = vpop.f32.mrf.mxu1 }
 0x2cc   : > { %v999_v9 = vpop.f32.mrf.mxu2 }
 0x2cd   : > { %v1024_v10 = vpack.c.bf16 %v999_v9, %v999_v9 }
 0x2cf   : > { %2433 = vmatmul.msk.bf16.vlgmr.msrb.gmra.mxu2 %vm812_vm1, %v1024_v10 }
 0x2d4   : > { %v1001_v11 = vpop.f32.mrf.mxu2  ;;  %v1018_v13 = vpop.f32.mrf.mxu3 }
 0x2d5   : > { %v1025_v14 = vpack.c.bf16 %v1018_v13, %v1018_v13  ;;  %v2711_v13 = vld [vmem:[%s3519_s10 + $0x10] sm:$0xff] }
 0x2d6   : > { %1283 = vmatpush.bf16.msra.mxu1 %v2711_v13  ;;  %v2721_v13 = vld [vmem:[%s3511_s2 + $0x40] sm:$0xff] }
 0x2d7   : > { %2434 = vmatmul.msk.bf16.vlgmr.msrb.gmra.mxu3 %vm812_vm1, %v1025_v14 }
 0x2dc   : > { %v1020_v15 = vpop.f32.mrf.mxu3 }
 0x33a   : > { %v1045_v16 = vpop.f32.mrf.mxu0 }
 0x33b   : > { %v1106_v22 = vsel %vm480_vm0, %v1045_v16, 0.0 }
 0x342   : > { %v1047_v17 = vpop.f32.mrf.mxu0  ;;  %v1064_v18 = vpop.f32.mrf.mxu1 }
 0x343   : > { %v1107_v21 = vsel %vm480_vm0, %v1064_v18, 0.0  ;;  %v2710_v18 = vld [vmem:[%s3519_s10 + $0x8] sm:$0xff] }
 0x344   : > { %v1108_v24 = vadd.f32 %v1107_v21, %v1106_v22  ;;  %1284 = vmatpush.bf16.msra.mxu1 %v2710_v18  ;;  %v2709_v22 = vld [vmem:[%s3519_s10] sm:$0xff] }
 0x348   : > { %1285 = vmatpush.bf16.msra.mxu1 %v2709_v22 }
 0x34a   : > { %v1066_v19 = vpop.f32.mrf.mxu1 }
 0x352   : > { %v1083_v20 = vpop.f32.mrf.mxu2 }
 0x353   : > { %v1109_v23 = vsel %vm480_vm0, %v1083_v20, 0.0 }
 0x354   : > { %v1110_v25 = vadd.f32 %v1109_v23, %v1108_v24 }
 0x35a   : > { %v1085_v26 = vpop.f32.mrf.mxu2  ;;  %v1102_v27 = vpop.f32.mrf.mxu3 }
 0x35b   : > { %v1111_v29 = vsel %vm480_vm0, %v1102_v27, 0.0 }
 0x35c   : > { %v1112_v30 = vadd.f32 %v1111_v29, %v1110_v25 }
 0x35e   : > { %v1117_v31 = vadd.f32 %v2791_v28, %v1112_v30 }
 0x360   : > { %v1118_v32 = vadd.f32 %v1117_v31, %v3103_v12 }
 0x362   : > { %v1104_v33 = vpop.f32.mrf.mxu3  ;;  %v1119_v34 = vsel %vm480_vm0, %v1118_v32, 0.0 }
 0x363   : > { %1120 = vadd.xlane.f32.xlu2 %v1119_v34 }
 0x3d6   : > { %v1121_v42 = vpop.xlane.xlu2 %1120 }
 0x3d7   : > { %v1129_v43 = vmul.f32 %v3208_v41, %v1121_v42 }
 0x3d9   : > { %v1130_v44 = vsub.f32 %v1118_v32, %v1129_v43 }
 0x3db   : > { %v1131_v45 = vmul.f32 %v1130_v44, %v1130_v44 }
 0x3dd   : > { %v1132_v12 = vsel %vm480_vm0, %v1131_v45, 0.0 }
 0x3de   : > { %1133 = vadd.xlane.f32.xlu0 %v1132_v12 }
 0x451   : > { %v1134_v48 = vpop.xlane.xlu0 %1133 }
 0x452   : > { %v1135_v49 = vmul.f32 %v1134_v48, %v3208_v41 }
 0x454   : > { %v1136_v50 = vadd.f32 1e-05, %v1135_v49  ;;  %v2795_v49 = vld [vmem:[%s3520_s11] ss:$0 sm:$0xff] }
 0x456   : > { %2817 = vrsqrt.f32 %v1136_v50  ;;  %vm1143_vm5 = vweird.f32 %v1136_v50 }
 0x45c   : > { %v2818_v51 = vpop.eup %2817 }
 0x45d   : > { %v1138_v52 = vmul.f32 %v2818_v51, %v1136_v50  ;;  %vm1144_vm4 = vweird.f32 %v2818_v51 }
 0x45e   : > { %vm1145_vm6 = vmor %vm1143_vm5, %vm1144_vm4 }
 0x45f   : > { %v1139_v53 = vmul.f32 %v2818_v51, %v1138_v52 }
 0x461   : > { %v1140_v54 = vmul.f32 0.5, %v1139_v53 }
 0x463   : > { %v1141_v55 = vsub.f32 1.5, %v1140_v54 }
 0x465   : > { %v1142_v56 = vmul.f32 %v2818_v51, %v1141_v55 }
 0x467   : > { %v1146_v58 = vsel %vm1145_vm6, %v2818_v51, %v1142_v56 }
 0x468   : > { %v1147_v60 = vmul.f32 %v1146_v58, %v1130_v44 }
 0x46a   : > { %v1151_v61 = vmul.f32 %v3222_v57, %v1147_v60 }
 0x46c   : > { %v3231_v62 = vadd.f32 %v3227_v59, %v1151_v61 }
 0x46e   : > { %v1156_v63 = vpack.c.bf16 %v3231_v62, %v3231_v62 }
 0x470   : > { %2443 = vmatmul.msk.bf16.vlgmr.msra.gmra.mxu0 %vm480_vm0, %v1156_v63  ;;  %v2714_v63 = vld [vmem:[%s3510_s1 + $0x48] sm:$0xff] }
 0x471   : > { %1355 = vmatpush.bf16.msra.mxu2 %v2714_v63 }
 0x4ed   : > { %v1189_v1 = vpop.f32.mrf.mxu0 }
 0x4ee   : > { %v1190_v2 = vadd.f32 %v2794_v0, %v1189_v1  ;;  %v2718_v0 = vld [vmem:[%s3510_s1 + $0x68] sm:$0xff]  ;;  %v2720_v1 = vld [vmem:[%s3510_s1 + $0x78] sm:$0xff] }
 0x4ef   : > { %1405 = vmatpush.bf16.msrb.mxu0 %v2718_v0  ;;  %1430 = vmatpush.bf16.msrb.mxu1 %v2720_v1 }
 0x4f0   : > { %v1194_v3 = vmul.f32 0.70710677, %v1190_v2  ;;  %v1193_v12 = vmul.f32 0.5, %v1190_v2  ;;  %v2713_v2 = vld [vmem:[%s3510_s1 + $0x40] sm:$0xff] }
 0x4f1   : > { %1356 = vmatpush.bf16.msra.mxu2 %v2713_v2 }
 0x4f2   : > { %v1195_v4 = vmul.f32 %v1194_v3, %v1194_v3 }
 0x4f4   : > { %v1196_v5 = vmin.f32 %v1195_v4, 16.0  ;;  %v2717_v4 = vld [vmem:[%s3510_s1 + $0x60] sm:$0xff] }
 0x4f5   : > { %v1191_v6 = vpop.f32.mrf.mxu0  ;;  %1406 = vmatpush.bf16.msrb.mxu0 %v2717_v4  ;;  %1472 = vmatpush.bf16.msrb.mxu2 %v2722_v7 }
 0x4f6   : > { %v1197_v8 = vmul.f32 2.1237322e-06, %v1196_v5  ;;  %v1208_v9 = vmul.f32 3.8918573e-05, %v1196_v5 }
 0x4f8   : > { %v1198_v10 = vadd.f32 0.00028619796, %v1197_v8  ;;  %v1209_v11 = vadd.f32 0.001143296, %v1208_v9  ;;  %v2724_v8 = vld [vmem:[%s3511_s2 + $0x58] sm:$0xff]  ;;  %v2726_v9 = vld [vmem:[%s3511_s2 + $0x68] sm:$0xff] }
 0x4f9   : > { %1522 = vmatpush.bf16.msra.mxu0 %v2726_v9  ;;  %1473 = vmatpush.bf16.msrb.mxu2 %v2721_v13 }
 0x4fa   : > { %v1199_v14 = vmul.f32 %v1198_v10, %v1196_v5  ;;  %v1210_v15 = vmul.f32 %v1209_v11, %v1196_v5  ;;  %v2728_v11 = vld [vmem:[%s3511_s2 + $0x78] sm:$0xff] }
 0x4fc   : > { %v1211_v16 = vadd.f32 0.014752088, %v1210_v15  ;;  %v1200_v17 = vadd.f32 0.0036580483, %v1199_v14  ;;  %v2723_v14 = vld [vmem:[%s3511_s2 + $0x50] sm:$0xff] }
 0x4fe   : > { %v1212_v19 = vmul.f32 %v1211_v16, %v1196_v5  ;;  %v1201_v21 = vmul.f32 %v1200_v17, %v1196_v5  ;;  %v2725_v16 = vld [vmem:[%s3511_s2 + $0x60] sm:$0xff]  ;;  %v2727_v17 = vld [vmem:[%s3511_s2 + $0x70] sm:$0xff] }
 0x4ff   : > { %1523 = vmatpush.bf16.msra.mxu0 %v2725_v16 }
 0x500   : > { %v1213_v20 = vadd.f32 0.112945676, %v1212_v19  ;;  %v1202_v25 = vadd.f32 0.05243302, %v1201_v21 }
 0x502   : > { %v1214_v23 = vmul.f32 %v1213_v20, %v1196_v5  ;;  %v1203_v28 = vmul.f32 %v1202_v25, %v1196_v5 }
 0x504   : > { %v1215_v24 = vadd.f32 0.4994258, %v1214_v23  ;;  %v1204_v29 = vadd.f32 0.18741608, %v1203_v28 }
 0x506   : > { %v1216_v26 = vmul.f32 %v1215_v24, %v1196_v5  ;;  %v1205_v31 = vmul.f32 %v1204_v29, %v1196_v5  ;;  %v2719_v5 = vld [vmem:[%s3510_s1 + $0x70] sm:$0xff]  ;;  %v2730_v29 = vld [vmem:[%s3512_s3 + $0x48] sm:$0xff] }
 0x507   : > { %1431 = vmatpush.bf16.msrb.mxu1 %v2719_v5 }
 0x508   : > { %v1217_v27 = vadd.f32 1.0, %v1216_v26  ;;  %v1206_v35 = vadd.f32 1.1283791, %v1205_v31  ;;  %v2734_v31 = vld [vmem:[%s3512_s3 + $0x68] sm:$0xff] }
 0x50a   : > { %2819 = vrcp.f32 %v1217_v27  ;;  %v1229_v34 = vand.u32 2147483648, %v1217_v27  ;;  %v1227_v37 = vand.u32 2147483647, %v1217_v27  ;;  %vm1223_vm8 = vweird.f32 %v1217_v27 }
 0x50b   : > { %v1207_v40 = vmul.f32 %v1206_v35, %v1194_v3  ;;  %v2715_v3 = vld [vmem:[%s3510_s1 + $0x50] sm:$0xff]  ;;  %v2733_v35 = vld [vmem:[%s3512_s3 + $0x60] sm:$0xff] }
 0x50c   : > { %v1230_v39 = vor.u32 1.1754944e-38, %v1229_v34  ;;  %vm1228_vm10 = vcmp.eq.f32.partialorder %v1227_v37, 8.507059e+37  ;;  %v2731_v34 = vld [vmem:[%s3512_s3 + $0x50] sm:$0xff] }
 0x510   : > { %v2820_v30 = vpop.eup %2819 }
 0x511   : > { %v1219_v32 = vmul.f32 %v2820_v30, %v1217_v27  ;;  %vm1224_vm7 = vweird.f32 %v2820_v30 }
 0x512   : > { %vm1225_vm9 = vmor %vm1223_vm8, %vm1224_vm7 }
 0x513   : > { %v1220_v33 = vsub.f32 1.0, %v1219_v32  ;;  %v2736_v32 = vld [vmem:[%s3512_s3 + $0x78] sm:$0xff] }
 0x515   : > { %v1221_v36 = vmul.f32 %v2820_v30, %v1220_v33  ;;  %v2729_v33 = vld [vmem:[%s3512_s3 + $0x40] sm:$0xff] }
 0x517   : > { %v1222_v38 = vadd.f32 %v2820_v30, %v1221_v36  ;;  %v2735_v36 = vld [vmem:[%s3512_s3 + $0x70] sm:$0xff] }
 0x519   : > { %v1226_v42 = vsel %vm1225_vm9, %v2820_v30, %v1222_v38  ;;  %v2732_v30 = vld [vmem:[%s3512_s3 + $0x58] sm:$0xff] }
 0x51a   : > { %v1231_v43 = vsel %vm1228_vm10, %v1230_v39, %v1226_v42 }
 0x51b   : > { %v1232_v44 = vmul.f32 %v1231_v43, %v1207_v40 }
 0x51d   : > { %v2444_v45 = vclamps-f32 %v1232_v44, 1.0 }
 0x51f   : > { %v1235_v46 = vadd.f32 1.0, %v2444_v45 }
 0x521   : > { %v1236_v47 = vmul.f32 %v1235_v46, %v1193_v12 }
 0x523   : > { %v1237_v48 = vpack.c.bf16 %v1236_v47, %v1236_v47 }
 0x525   : > { %2461 = vmatmul.msk.bf16.vlgmr.msra.gmra.mxu1 %vm1274_vm11, %v1237_v48 }
 0x526   : > { %1547 = vmatpush.bf16.msra.mxu1 %v2728_v11 }
 0x52a   : > { %1548 = vmatpush.bf16.msra.mxu1 %v2727_v17 }
 0x5a2   : > { %v1287_v50 = vpop.f32.mrf.mxu1 }
 0x5a3   : > { %v1288_v51 = vadd.f32 %v2795_v49, %v1287_v50 }
 0x5a5   : > { %v1291_v52 = vadd.f32 %v1288_v51, %v3231_v62  ;;  %v2716_v62 = vld [vmem:[%s3510_s1 + $0x58] sm:$0xff] }
 0x5a6   : > { %1380 = vmatpush.bf16.msra.mxu3 %v2716_v62 }
 0x5a7   : > { %v1292_v53 = vsel %vm480_vm0, %v1291_v52, 0.0 }
 0x5a8   : > { %1293 = vadd.xlane.f32.xlu1 %v1292_v53 }
 0x5aa   : > { %v1289_v54 = vpop.f32.mrf.mxu1  ;;  %1381 = vmatpush.bf16.msra.mxu3 %v2715_v3 }
 0x5ae   : > { %1497 = vmatpush.bf16.msrb.mxu3 %v2724_v8 }
 0x5b2   : > { %1498 = vmatpush.bf16.msrb.mxu3 %v2723_v14 }
 0x61b   : > { %v1294_v55 = vpop.xlane.xlu1 %1293 }
 0x61c   : > { %v1295_v56 = vmul.f32 %v1294_v55, %v3208_v41 }
 0x61e   : > { %v1296_v58 = vsub.f32 %v1291_v52, %v1295_v56 }
 0x620   : > { %v1297_v60 = vmul.f32 %v1296_v58, %v1296_v58 }
 0x622   : > { %v1298_v61 = vsel %vm480_vm0, %v1297_v60, 0.0 }
 0x623   : > { %1299 = vadd.xlane.f32.xlu2 %v1298_v61 }
 0x696   : > { %v1300_v6 = vpop.xlane.xlu2 %1299 }
 0x697   : > { %v1301_v10 = vmul.f32 %v1300_v6, %v3208_v41 }
 0x699   : > { %v1302_v15 = vadd.f32 1e-05, %v1301_v10 }
 0x69b   : > { %2821 = vrsqrt.f32 %v1302_v15  ;;  %vm1309_vm13 = vweird.f32 %v1302_v15 }
 0x6a1   : > { %v2822_v18 = vpop.eup %2821 }
 0x6a2   : > { %v1304_v19 = vmul.f32 %v2822_v18, %v1302_v15  ;;  %vm1310_vm12 = vweird.f32 %v2822_v18 }
 0x6a3   : > { %vm1311_vm14 = vmor %vm1309_vm13, %vm1310_vm12 }
 0x6a4   : > { %v1305_v20 = vmul.f32 %v2822_v18, %v1304_v19 }
 0x6a6   : > { %v1306_v21 = vmul.f32 0.5, %v1305_v20 }
 0x6a8   : > { %v1307_v22 = vsub.f32 1.5, %v1306_v21 }
 0x6aa   : > { %v1308_v23 = vmul.f32 %v2822_v18, %v1307_v22 }
 0x6ac   : > { %v1312_v24 = vsel %vm1311_vm14, %v2822_v18, %v1308_v23 }
 0x6ad   : > { %v1313_v25 = vmul.f32 %v1312_v24, %v1296_v58 }
 0x6af   : > { %v1314_v26 = vmul.f32 %v3222_v57, %v1313_v25 }
 0x6b1   : > { %v3310_v27 = vadd.f32 %v3227_v59, %v1314_v26 }
 0x6b3   : > { %v1316_v28 = vpack.c.bf16 %v3310_v27, %v3310_v27 }
 0x6b5   : > { %2486 = vmatmul.msk.bf16.vlgmr.msra.gmra.mxu2 %vm480_vm0, %v1316_v28  ;;  %2495 = vmatmul.msk.bf16.vlgmr.msra.gmra.mxu3 %vm480_vm0, %v1316_v28 }
 0x6b6   : > { %2504 = vmatmul.msk.bf16.vlgmr.msrb.gmra.mxu0 %vm480_vm0, %v1316_v28  ;;  %2513 = vmatmul.msk.bf16.vlgmr.msrb.gmra.mxu1 %vm480_vm0, %v1316_v28 }
 0x6b7   : > { %1589 = vmatpush.bf16.msra.mxu2 %v2730_v29  ;;  %1614 = vmatpush.bf16.msra.mxu3 %v2732_v30 }
 0x6b8   : > { %1639 = vmatpush.bf16.msrb.mxu0 %v2734_v31  ;;  %1664 = vmatpush.bf16.msrb.mxu1 %v2736_v32 }
 0x6bb   : > { %1590 = vmatpush.bf16.msra.mxu2 %v2729_v33  ;;  %1615 = vmatpush.bf16.msra.mxu3 %v2731_v34 }
 0x6bc   : > { %1640 = vmatpush.bf16.msrb.mxu0 %v2733_v35  ;;  %1665 = vmatpush.bf16.msrb.mxu1 %v2735_v36 }
 0x6c5   : > { %2538 = vmatmul.msk.bf16.vlgmr.msrb.gmra.mxu2 %vm480_vm0, %v1316_v28  ;;  %2547 = vmatmul.msk.bf16.vlgmr.msrb.gmra.mxu3 %vm480_vm0, %v1316_v28 }
 0x6c6   : > { %2556 = vmatmul.msk.bf16.vlgmr.msra.gmra.mxu0 %vm480_vm0, %v1316_v28  ;;  %2565 = vmatmul.msk.bf16.vlgmr.msra.gmra.mxu1 %vm480_vm0, %v1316_v28 }
 0x6d5   : > { %2590 = vmatmul.msk.bf16.vlgmr.msra.gmra.mxu2 %vm480_vm0, %v1316_v28  ;;  %2599 = vmatmul.msk.bf16.vlgmr.msra.gmra.mxu3 %vm480_vm0, %v1316_v28 }
 0x6d6   : > { %2608 = vmatmul.msk.bf16.vlgmr.msrb.gmra.mxu0 %vm480_vm0, %v1316_v28  ;;  %2617 = vmatmul.msk.bf16.vlgmr.msrb.gmra.mxu1 %vm480_vm0, %v1316_v28 }
 0x733   : > { %v1408_v37 = vpop.f32.mrf.mxu0  ;;  %v1433_v38 = vpop.f32.mrf.mxu1 }
 0x734   : > { %v1673_v61 = vpack.c.bf16 %v1408_v37, %v1408_v37  ;;  %v1674_v63 = vpack.c.bf16 %v1433_v38, %v1433_v38 }
 0x738   : > { %v1358_v39 = vpop.f32.mrf.mxu2  ;;  %v1383_v40 = vpop.f32.mrf.mxu3 }
 0x739   : > { %v1671_v1 = vpack.c.bf16 %v1358_v39, %v1358_v39  ;;  %v1672_v2 = vpack.c.bf16 %v1383_v40, %v1383_v40 }
 0x73b   : > { %v1410_v42 = vpop.f32.mrf.mxu0  ;;  %v1435_v43 = vpop.f32.mrf.mxu1 }
 0x740   : > { %v1360_v44 = vpop.f32.mrf.mxu2  ;;  %v1385_v45 = vpop.f32.mrf.mxu3 }
 0x743   : > { %v1525_v12 = vpop.f32.mrf.mxu0  ;;  %v1550_v46 = vpop.f32.mrf.mxu1 }
 0x744   : > { %v1677_v47 = vpack.c.bf16 %v1525_v12, %v1525_v12  ;;  %v1678_v48 = vpack.c.bf16 %v1550_v46, %v1550_v46 }
 0x746   : > { %v1721_v49 = vsel %vm812_vm1, %v1677_v47, 0  ;;  %v1740_v50 = vsel %vm812_vm1, %v1678_v48, 0 }
 0x747   : > { %1730 = vmatpush.bf16.xpose.msra.mxu0 %v1721_v49  ;;  %1749 = vmatpush.bf16.xpose.msra.mxu1 %v1740_v50 }
 0x748   : > { %v1475_v51 = vpop.f32.mrf.mxu2  ;;  %v1500_v52 = vpop.f32.mrf.mxu3 }
 0x749   : > { %v1675_v53 = vpack.c.bf16 %v1475_v51, %v1475_v51  ;;  %v1676_v54 = vpack.c.bf16 %v1500_v52, %v1500_v52 }
 0x74b   : > { %v1683_v55 = vsel %vm812_vm1, %v1675_v53, 0  ;;  %v1702_v56 = vsel %vm812_vm1, %v1676_v54, 0  ;;  %v1527_v58 = vpop.f32.mrf.mxu0  ;;  %v1552_v60 = vpop.f32.mrf.mxu1 }
 0x74c   : > { %1692 = vmatpush.bf16.xpose.msrb.mxu2 %v1683_v55  ;;  %1711 = vmatpush.bf16.xpose.msrb.mxu3 %v1702_v56 }
 0x74e   : > { %2620 = vmatmul.msk.bf16.vlgmr.msra.gmra.mxu0 %vm812_vm1, %v1673_v61  ;;  %2621 = vmatmul.msk.bf16.vlgmr.msra.gmra.mxu1 %vm812_vm1, %v1674_v63 }
 0x750   : > { %v1477_v62 = vpop.f32.mrf.mxu2  ;;  %v1502_v0 = vpop.f32.mrf.mxu3 }
 0x753   : > { %v1642_v3 = vpop.f32.mrf.mxu0  ;;  %v1667_v4 = vpop.f32.mrf.mxu1  ;;  %2618 = vmatmul.msk.bf16.vlgmr.msrb.gmra.mxu2 %vm812_vm1, %v1671_v1  ;;  %2619 = vmatmul.msk.bf16.vlgmr.msrb.gmra.mxu3 %vm812_vm1, %v1672_v2 }
 0x754   : > { %v1809_v5 = vpack.c.bf16 %v1642_v3, %v1642_v3  ;;  %v1810_v6 = vpack.c.bf16 %v1667_v4, %v1667_v4 }
 0x756   : > { %v1853_v7 = vsel %vm948_vm2, %v1809_v5, 0  ;;  %v1872_v8 = vsel %vm948_vm2, %v1810_v6, 0 }
 0x757   : > { %1862 = vmatpush.bf16.msrb.mxu0 %v1853_v7  ;;  %1881 = vmatpush.bf16.msrb.mxu1 %v1872_v8 }
 0x758   : > { %v1592_v9 = vpop.f32.mrf.mxu2  ;;  %v1617_v10 = vpop.f32.mrf.mxu3 }
 0x759   : > { %v1807_v11 = vpack.c.bf16 %v1592_v9, %v1592_v9  ;;  %v1808_v13 = vpack.c.bf16 %v1617_v10, %v1617_v10 }
 0x75b   : > { %v1815_v14 = vsel %vm948_vm2, %v1807_v11, 0  ;;  %v1834_v15 = vsel %vm948_vm2, %v1808_v13, 0  ;;  %v1644_v16 = vpop.f32.mrf.mxu0  ;;  %v1669_v17 = vpop.f32.mrf.mxu1  ;;  %v2628_v11 = vld [vmem:[%s3513_s4 + $0x18] sm:$0xf] }
 0x75c   : > { %1824 = vmatpush.bf16.msra.mxu2 %v1815_v14  ;;  %1843 = vmatpush.bf16.msra.mxu3 %v1834_v15  ;;  %v1938_v13 = vsel %vm948_vm2, %v2628_v11, 0  ;;  %v2626_v14 = vld [vmem:[%s3513_s4 + $0x10] sm:$0xf]  ;;  %v2627_v15 = vld [vmem:[%s3513_s4 + $0x14] sm:$0xf] }
 0x75d   : > { %1947 = vmatpush.bf16.msra.mxu0 %v1938_v13  ;;  %v1900_v16 = vsel %vm948_vm2, %v2626_v14, 0  ;;  %v1919_v17 = vsel %vm948_vm2, %v2627_v15, 0 }
 0x760   : > { %v1594_v18 = vpop.f32.mrf.mxu2  ;;  %v1619_v19 = vpop.f32.mrf.mxu3  ;;  %1909 = vmatpush.bf16.msrb.mxu2 %v1900_v16  ;;  %1928 = vmatpush.bf16.msrb.mxu3 %v1919_v17 }
 0x761   : > { %v2629_v18 = vld [vmem:[%s3513_s4 + $0x1c] sm:$0xf] }
 0x762   : > { %v1957_v19 = vsel %vm948_vm2, %v2629_v18, 0  ;;  %v2742_v18 = vld [vmem:[%s3519_s10 + $0x38] sm:$0xff] }
 0x763   : > { %1966 = vmatpush.bf16.msra.mxu1 %v1957_v19 }
 0x7cb   : > { %v1732_v20 = vpop.f32.mrf.mxu0  ;;  %v1751_v21 = vpop.f32.mrf.mxu1 }
 0x7cc   : > { %v1757_v22 = vmul.f32 0.35355338, %v1732_v20  ;;  %v1758_v23 = vmul.f32 0.35355338, %v1751_v21 }
 0x7ce   : > { %2176 = vst.msk [vmem:[%s3366_s16 + $0x10] sm:$0xff] %vm812_vm1, %v1757_v22  ;;  %v1765_v24 = vsel %vm812_vm1, %v1757_v22, -inf  ;;  %v1768_v36 = vsel %vm812_vm1, %v1758_v23, -inf }
 0x7cf   : > { %2177 = vst.msk [vmem:[%s3366_s16 + $0x18] sm:$0xff] %vm812_vm1, %v1758_v23  ;;  %1766 = vmax.xlane.f32.xlu2 %v1765_v24 }
 0x7d3   : > { %v1734_v25 = vpop.f32.mrf.mxu0  ;;  %v1753_v26 = vpop.f32.mrf.mxu1 }
 0x7d6   : > { %v1694_v28 = vpop.f32.mrf.mxu2  ;;  %v1713_v29 = vpop.f32.mrf.mxu3 }
 0x7d7   : > { %v1755_v30 = vmul.f32 0.35355338, %v1694_v28  ;;  %v1756_v31 = vmul.f32 0.35355338, %v1713_v29 }
 0x7d9   : > { %2174 = vst.msk [vmem:[%s3366_s16] sm:$0xff] %vm812_vm1, %v1755_v30  ;;  %v1762_v32 = vsel %vm812_vm1, %v1756_v31, -inf  ;;  %v1759_v33 = vsel %vm812_vm1, %v1755_v30, -inf }
 0x7da   : > { %2175 = vst.msk [vmem:[%s3366_s16 + $0x8] sm:$0xff] %vm812_vm1, %v1756_v31  ;;  %1763 = vmax.xlane.f32.xlu1 %v1762_v32  ;;  %1760 = vmax.xlane.f32.xlu0 %v1759_v33 }
 0x7de   : > { %v1696_v34 = vpop.f32.mrf.mxu2  ;;  %v1715_v35 = vpop.f32.mrf.mxu3 }
 0x7e2   : > { %1769 = vmax.xlane.f32.xlu0 %v1768_v36 }
 0x842   : > { %v1767_v37 = vpop.xlane.xlu2 %1766 }
 0x843   : > { %v1773_v38 = vsub.f32 %v1757_v22, %v1767_v37 }
 0x845   : > { %v1779_v39 = vmul.f32 1.442695, %v1773_v38 }
 0x847   : > { %2823 = vpow2.f32 %v1779_v39 }
 0x84d   : > { %v2824_v40 = vpop.eup %2823  ;;  %v1764_v42 = vpop.xlane.xlu1 %1763 }
 0x84e   : > { %v1761_v43 = vpop.xlane.xlu0 %1760  ;;  %v1772_v44 = vsub.f32 %v1756_v31, %v1764_v42  ;;  %v1789_v12 = vsel %vm812_vm1, %v2824_v40, 0.0 }
 0x84f   : > { %v1771_v45 = vsub.f32 %v1755_v30, %v1761_v43  ;;  %1790 = vadd.xlane.f32.xlu0 %v1789_v12 }
 0x850   : > { %v1777_v46 = vmul.f32 1.442695, %v1772_v44 }
 0x851   : > { %v1775_v47 = vmul.f32 1.442695, %v1771_v45  ;;  %v2796_v45 = vld [vmem:[%s3514_s5 + $0x1] ss:$0 sm:$0xff] }
 0x852   : > { %2825 = vpow2.f32 %v1777_v46 }
 0x853   : > { %2827 = vpow2.f32 %v1775_v47 }
 0x856   : > { %v1770_v48 = vpop.xlane.xlu0 %1769 }
 0x857   : > { %v1774_v49 = vsub.f32 %v1758_v23, %v1770_v48 }
 0x858   : > { %v2826_v50 = vpop.eup %2825 }
 0x859   : > { %v1781_v51 = vmul.f32 1.442695, %v1774_v49  ;;  %v2828_v52 = vpop.eup %2827  ;;  %v1786_v53 = vsel %vm812_vm1, %v2826_v50, 0.0 }
 0x85a   : > { %1787 = vadd.xlane.f32.xlu2 %v1786_v53  ;;  %v1783_v54 = vsel %vm812_vm1, %v2828_v52, 0.0 }
 0x85b   : > { %2829 = vpow2.f32 %v1781_v51  ;;  %1784 = vadd.xlane.f32.xlu1 %v1783_v54 }
 0x861   : > { %v2830_v55 = vpop.eup %2829 }
 0x862   : > { %v1792_v56 = vsel %vm812_vm1, %v2830_v55, 0.0 }
 0x863   : > { %1793 = vadd.xlane.f32.xlu1 %v1792_v56 }
 0x8c2   : > { %v1791_v58 = vpop.xlane.xlu0 %1790 }
 0x8c3   : > { %2831 = vrcp.f32 %v1791_v58  ;;  %v2738_v58 = vld [vmem:[%s3517_s8 + $0x18] sm:$0xff] }
 0x8c9   : > { %v2832_v60 = vpop.eup %2831 }
 0x8ca   : > { %v1801_v61 = vmul.f32 %v2832_v60, %v2824_v40 }
 0x8cc   : > { %v1805_v63 = vpack.c.bf16 %v1801_v61, %v1801_v61 }
 0x8cd   : > { %v1788_v62 = vpop.xlane.xlu2 %1787 }
 0x8ce   : > { %2833 = vrcp.f32 %v1788_v62  ;;  %v1785_v0 = vpop.xlane.xlu1 %1784  ;;  %2624 = vmatmul.msk.bf16.vlgmr.msrb.gmra.mxu0 %vm812_vm1, %v1805_v63 }
 0x8cf   : > { %2835 = vrcp.f32 %v1785_v0 }
 0x8d4   : > { %v2834_v1 = vpop.eup %2833 }
 0x8d5   : > { %v2836_v2 = vpop.eup %2835  ;;  %v1800_v3 = vmul.f32 %v2834_v1, %v2826_v50 }
 0x8d6   : > { %v1799_v4 = vmul.f32 %v2836_v2, %v2828_v52  ;;  %v1794_v5 = vpop.xlane.xlu1 %1793 }
 0x8d7   : > { %v1804_v6 = vpack.c.bf16 %v1800_v3, %v1800_v3  ;;  %2837 = vrcp.f32 %v1794_v5 }
 0x8d8   : > { %v1803_v7 = vpack.c.bf16 %v1799_v4, %v1799_v4 }
 0x8d9   : > { %2623 = vmatmul.msk.bf16.vlgmr.msra.gmra.mxu3 %vm812_vm1, %v1804_v6 }
 0x8da   : > { %2622 = vmatmul.msk.bf16.vlgmr.msra.gmra.mxu2 %vm812_vm1, %v1803_v7  ;;  %2139 = vmatpush.bf16.msra.mxu3 %v2742_v18 }
 0x8db   : > { %2042 = vmatpush.bf16.msra.mxu2 %v2738_v58 }
 0x8dd   : > { %v2838_v8 = vpop.eup %2837 }
 0x8de   : > { %v1802_v9 = vmul.f32 %v2838_v8, %v2830_v55 }
 0x8e0   : > { %v1806_v10 = vpack.c.bf16 %v1802_v9, %v1802_v9 }
 0x8e2   : > { %2625 = vmatmul.msk.bf16.vlgmr.msrb.gmra.mxu1 %vm812_vm1, %v1806_v10  ;;  %v2797_v10 = vld [vmem:[%s3518_s9 + $0x1] ss:$0 sm:$0xff] }
 0x94b   : > { %v1864_v20 = vpop.f32.mrf.mxu0 }
 0x94c   : > { %v1889_v21 = vpack.c.bf16 %v1864_v20, %v1864_v20 }
 0x94e   : > { %2632 = vmatmul.msk.bf16.vlgmr.msra.gmra.mxu0 %vm812_vm1, %v1889_v21 }
 0x953   : > { %v1866_v22 = vpop.f32.mrf.mxu0 }
 0x95c   : > { %v1845_v23 = vpop.f32.mrf.mxu3 }
 0x95d   : > { %v1826_v24 = vpop.f32.mrf.mxu2  ;;  %v1888_v25 = vpack.c.bf16 %v1845_v23, %v1845_v23  ;;  %v2741_v23 = vld [vmem:[%s3519_s10 + $0x30] sm:$0xff] }
 0x95e   : > { %v1887_v26 = vpack.c.bf16 %v1826_v24, %v1826_v24  ;;  %2140 = vmatpush.bf16.msra.mxu3 %v2741_v23 }
 0x95f   : > { %v1883_v28 = vpop.f32.mrf.mxu1  ;;  %2631 = vmatmul.msk.bf16.vlgmr.msrb.gmra.mxu3 %vm812_vm1, %v1888_v25 }
 0x960   : > { %v1890_v29 = vpack.c.bf16 %v1883_v28, %v1883_v28  ;;  %2630 = vmatmul.msk.bf16.vlgmr.msrb.gmra.mxu2 %vm812_vm1, %v1887_v26 }
 0x962   : > { %2633 = vmatmul.msk.bf16.vlgmr.msra.gmra.mxu1 %vm812_vm1, %v1890_v29  ;;  %v2740_v29 = vld [vmem:[%s3519_s10 + $0x28] sm:$0xff] }
 0x963   : > { %2141 = vmatpush.bf16.msra.mxu3 %v2740_v29 }
 0x964   : > { %v1847_v30 = vpop.f32.mrf.mxu3 }
 0x965   : > { %v1828_v31 = vpop.f32.mrf.mxu2 }
 0x967   : > { %v1885_v32 = vpop.f32.mrf.mxu1 }
 0x9cb   : > { %v1949_v33 = vpop.f32.mrf.mxu0 }
 0x9cc   : > { %v1975_v42 = vsel %vm480_vm0, %v1949_v33, 0.0  ;;  %v2739_v33 = vld [vmem:[%s3519_s10 + $0x20] sm:$0xff] }
 0x9cd   : > { %2142 = vmatpush.bf16.msra.mxu3 %v2739_v33 }
 0x9d3   : > { %v1951_v34 = vpop.f32.mrf.mxu0 }
 0x9df   : > { %v1968_v35 = vpop.f32.mrf.mxu1 }
 0x9e0   : > { %v1977_v12 = vsel %vm480_vm0, %v1968_v35, 0.0 }
 0x9e2   : > { %v1930_v36 = vpop.f32.mrf.mxu3 }
 0x9e3   : > { %v1911_v37 = vpop.f32.mrf.mxu2  ;;  %v1973_v38 = vsel %vm480_vm0, %v1930_v36, 0.0 }
 0x9e4   : > { %v1972_v39 = vsel %vm480_vm0, %v1911_v37, 0.0 }
 0x9e5   : > { %v1974_v40 = vadd.f32 %v1973_v38, %v1972_v39 }
 0x9e7   : > { %v1976_v43 = vadd.f32 %v1975_v42, %v1974_v40  ;;  %v1970_v44 = vpop.f32.mrf.mxu1 }
 0x9e9   : > { %v1978_v46 = vadd.f32 %v1977_v12, %v1976_v43 }
 0x9ea   : > { %v1932_v47 = vpop.f32.mrf.mxu3 }
 0x9eb   : > { %v1913_v48 = vpop.f32.mrf.mxu2  ;;  %v1984_v49 = vadd.f32 %v2796_v45, %v1978_v46 }
 0x9ed   : > { %v1985_v50 = vadd.f32 %v1984_v49, %v3310_v27  ;;  %v2737_v27 = vld [vmem:[%s3517_s8 + $0x10] sm:$0xff] }
 0x9ee   : > { %2043 = vmatpush.bf16.msra.mxu2 %v2737_v27 }
 0x9ef   : > { %v1986_v51 = vsel %vm480_vm0, %v1985_v50, 0.0 }
 0x9f0   : > { %1987 = vadd.xlane.f32.xlu2 %v1986_v51 }
 0xa63   : > { %v1988_v52 = vpop.xlane.xlu2 %1987 }
 0xa64   : > { %v1989_v53 = vmul.f32 %v1988_v52, %v3208_v41 }
 0xa66   : > { %v1990_v54 = vsub.f32 %v1985_v50, %v1989_v53 }
 0xa68   : > { %v1991_v55 = vmul.f32 %v1990_v54, %v1990_v54 }
 0xa6a   : > { %v1992_v56 = vsel %vm480_vm0, %v1991_v55, 0.0 }
 0xa6b   : > { %1993 = vadd.xlane.f32.xlu0 %v1992_v56 }
 0xade   : > { %v1994_v60 = vpop.xlane.xlu0 %1993 }
 0xadf   : > { %v1995_v61 = vmul.f32 %v1994_v60, %v3208_v41 }
 0xae1   : > { %v1996_v63 = vadd.f32 1e-05, %v1995_v61  ;;  %v2798_v61 = vld [vmem:[%s3520_s11 + $0x1] ss:$0 sm:$0xff] }
 0xae3   : > { %2839 = vrsqrt.f32 %v1996_v63  ;;  %vm2003_vm1 = vweird.f32 %v1996_v63 }
 0xae9   : > { %v2840_v62 = vpop.eup %2839 }
 0xaea   : > { %v1998_v0 = vmul.f32 %v2840_v62, %v1996_v63  ;;  %vm2004_vm15 = vweird.f32 %v2840_v62 }
 0xaeb   : > { %vm2005_vm2 = vmor %vm2003_vm1, %vm2004_vm15 }
 0xaec   : > { %v1999_v1 = vmul.f32 %v2840_v62, %v1998_v0 }
 0xaee   : > { %v2000_v2 = vmul.f32 0.5, %v1999_v1 }
 0xaf0   : > { %v2001_v3 = vsub.f32 1.5, %v2000_v2 }
 0xaf2   : > { %v2002_v4 = vmul.f32 %v2840_v62, %v2001_v3 }
 0xaf4   : > { %v2006_v5 = vsel %vm2005_vm2, %v2840_v62, %v2002_v4 }
 0xaf5   : > { %v2007_v6 = vmul.f32 %v2006_v5, %v1990_v54 }
 0xaf7   : > { %v2008_v7 = vmul.f32 %v3222_v57, %v2007_v6 }
 0xaf9   : > { %v3428_v8 = vadd.f32 %v3227_v59, %v2008_v7 }
 0xafb   : > { %v2010_v9 = vpack.c.bf16 %v3428_v8, %v3428_v8 }
 0xafd   : > { %2648 = vmatmul.msk.bf16.vlgmr.msra.gmra.mxu2 %vm480_vm0, %v2010_v9 }
 0xb80   : > { %v2045_v11 = vpop.f32.mrf.mxu2 }
 0xb81   : > { %v2046_v13 = vadd.f32 %v2797_v10, %v2045_v11 }
 0xb83   : > { %v2050_v14 = vmul.f32 0.70710677, %v2046_v13  ;;  %v2049_v56 = vmul.f32 0.5, %v2046_v13 }
 0xb85   : > { %v2051_v15 = vmul.f32 %v2050_v14, %v2050_v14 }
 0xb87   : > { %v2052_v16 = vmin.f32 %v2051_v15, 16.0 }
 0xb88   : > { %v2047_v17 = vpop.f32.mrf.mxu2 }
 0xb89   : > { %v2053_v19 = vmul.f32 2.1237322e-06, %v2052_v16  ;;  %v2064_v20 = vmul.f32 3.8918573e-05, %v2052_v16 }
 0xb8b   : > { %v2054_v21 = vadd.f32 0.00028619796, %v2053_v19  ;;  %v2065_v22 = vadd.f32 0.001143296, %v2064_v20 }
 0xb8d   : > { %v2055_v24 = vmul.f32 %v2054_v21, %v2052_v16  ;;  %v2066_v25 = vmul.f32 %v2065_v22, %v2052_v16 }
 0xb8f   : > { %v2067_v26 = vadd.f32 0.014752088, %v2066_v25  ;;  %v2056_v28 = vadd.f32 0.0036580483, %v2055_v24 }
 0xb91   : > { %v2068_v30 = vmul.f32 %v2067_v26, %v2052_v16  ;;  %v2057_v32 = vmul.f32 %v2056_v28, %v2052_v16 }
 0xb93   : > { %v2069_v31 = vadd.f32 0.112945676, %v2068_v30  ;;  %v2058_v36 = vadd.f32 0.05243302, %v2057_v32 }
 0xb95   : > { %v2070_v34 = vmul.f32 %v2069_v31, %v2052_v16  ;;  %v2059_v39 = vmul.f32 %v2058_v36, %v2052_v16 }
 0xb97   : > { %v2071_v35 = vadd.f32 0.4994258, %v2070_v34  ;;  %v2060_v40 = vadd.f32 0.18741608, %v2059_v39 }
 0xb99   : > { %v2072_v37 = vmul.f32 %v2071_v35, %v2052_v16  ;;  %v2061_v43 = vmul.f32 %v2060_v40, %v2052_v16 }
 0xb9b   : > { %v2073_v38 = vadd.f32 1.0, %v2072_v37  ;;  %v2062_v46 = vadd.f32 1.1283791, %v2061_v43 }
 0xb9d   : > { %2841 = vrcp.f32 %v2073_v38  ;;  %v2085_v12 = vand.u32 2147483648, %v2073_v38  ;;  %v2083_v48 = vand.u32 2147483647, %v2073_v38  ;;  %vm2079_vm4 = vweird.f32 %v2073_v38 }
 0xb9e   : > { %v2063_v51 = vmul.f32 %v2062_v46, %v2050_v14 }
 0xb9f   : > { %v2086_v50 = vor.u32 1.1754944e-38, %v2085_v12  ;;  %vm2084_vm6 = vcmp.eq.f32.partialorder %v2083_v48, 8.507059e+37 }
 0xba3   : > { %v2842_v42 = vpop.eup %2841 }
 0xba4   : > { %v2075_v44 = vmul.f32 %v2842_v42, %v2073_v38  ;;  %vm2080_vm3 = vweird.f32 %v2842_v42 }
 0xba5   : > { %vm2081_vm5 = vmor %vm2079_vm4, %vm2080_vm3 }
 0xba6   : > { %v2076_v45 = vsub.f32 1.0, %v2075_v44 }
 0xba8   : > { %v2077_v47 = vmul.f32 %v2842_v42, %v2076_v45 }
 0xbaa   : > { %v2078_v49 = vadd.f32 %v2842_v42, %v2077_v47 }
 0xbac   : > { %v2082_v52 = vsel %vm2081_vm5, %v2842_v42, %v2078_v49 }
 0xbad   : > { %v2087_v53 = vsel %vm2084_vm6, %v2086_v50, %v2082_v52 }
 0xbae   : > { %v2088_v54 = vmul.f32 %v2087_v53, %v2063_v51 }
 0xbb0   : > { %v2649_v55 = vclamps-f32 %v2088_v54, 1.0 }
 0xbb2   : > { %v2091_v58 = vadd.f32 1.0, %v2649_v55 }
 0xbb4   : > { %v2092_v27 = vmul.f32 %v2091_v58, %v2049_v56 }
 0xbb6   : > { %v2093_v60 = vpack.c.bf16 %v2092_v27, %v2092_v27 }
 0xbb8   : > { %2675 = vmatmul.msk.bf16.vlgmr.msra.gmra.mxu3 %vm1274_vm11, %v2093_v60 }
 0xc3b   : > { %v2144_v63 = vpop.f32.mrf.mxu3 }
 0xc3c   : > { %v2145_v62 = vadd.f32 %v2798_v61, %v2144_v63 }
 0xc3e   : > { %v2148_v0 = vadd.f32 %v2145_v62, %v3428_v8 }
 0xc40   : > { %v2149_v1 = vsel %vm480_vm0, %v2148_v0, 0.0 }
 0xc41   : > { %2150 = vadd.xlane.f32.xlu1 %v2149_v1 }
 0xc43   : > { %v2146_v2 = vpop.f32.mrf.mxu3 }
 0xcb4   : > { %v2151_v3 = vpop.xlane.xlu1 %2150 }
 0xcb5   : > { %v2152_v4 = vmul.f32 %v2151_v3, %v3208_v41 }
 0xcb7   : > { %v2153_v5 = vsub.f32 %v2148_v0, %v2152_v4 }
 0xcb9   : > { %v2154_v6 = vmul.f32 %v2153_v5, %v2153_v5 }
 0xcbb   : > { %v2155_v7 = vsel %vm480_vm0, %v2154_v6, 0.0 }
 0xcbc   : > { %2156 = vadd.xlane.f32.xlu2 %v2155_v7 }
 0xcbd   : > { %2872 = shalt.err (!%p2869_p3)
}
 0xcbe   : > { %s2942_s27 = smov 128   ;;  %s2943_s23 = smov 8  }
 0xcbf   : > { %2745 = dma.vmem_to_hbm [thread:$0]  (%p3052_p5), %s2211_s21, 512, %s2213_s14, %s2184_s19, %s2942_s27, %s2942_s27, %s2943_s23  }
 0xcc0   : > { %s2312_s0 = sshll.u32 %s3363_s25, 3  ;;  %s2678_s24 = sshll.u32 %s3035_s29, 3 }
 0xcc1   : > { %s2194_s21 = scalar_lea.hbm %s3521_s12, %s2678_s24  ;;  %s435_s14 = scalar_lea.vmem [#allocation2], %s2312_s0 }
 0xcc2   : > { %s2196_s19 = sshll.u32 %s435_s14, 4  ;;  %s2198_s22 = sshll.u32 %s2194_s21, 4  ;;  %s2197_s19 = int_to_ptr.vmem [resolvable:$true] %s2196_s19  ;;  %s2199_s22 = int_to_ptr.hbm [resolvable:$true] %s2198_s22 }
 0xcc3   : > { %s2179_s29 = scalar_lea.sflag [#allocation3], %s3363_s25  ;;  %s2887_s15 = sshra.s32 %s2199_s22, 4  ;;  %s2888_s15 = int_to_ptr.hbm [resolvable:$true] %s2887_s15 }
 0xcc4   : > { %s2889_s17 = scalar_lea.hbm %s2888_s15, 8  ;;  %s2893_s27 = scalar_lea.hbm %s3521_s12, 16 }
 0xcc5   : > { %p2890_p4 = scmp.ne.s32.totalorder %s2888_s15, %s2889_s17  ;;  %p2894_p9 = scmp.lt.s32.totalorder %s2888_s15, %s3521_s12 }
 0xcc6   : > { %p2895_p10 = scmp.lt.s32.totalorder %s2893_s27, %s2889_s17 }
 0xcc7   : > { %p2891_p7 = pnand %p2890_p4, %p3052_p5 }
 0xcc8   : > { %p2896_p11 = por %p2895_p10, %p2894_p9 }
 0xcc9   : > { %p2892_p8 = pneg %p2891_p7 }
 0xccb   : > { %p2897_p12 = pnand %p2896_p11, %p2892_p8 }
 0xd2f   : > { %v2157_v8 = vpop.xlane.xlu2 %2156 }
 0xd30   : > { %v2158_v9 = vmul.f32 %v2157_v8, %v3208_v41 }
 0xd32   : > { %v2159_v10 = vadd.f32 1e-05, %v2158_v9 }
 0xd34   : > { %2843 = vrsqrt.f32 %v2159_v10  ;;  %vm2166_vm8 = vweird.f32 %v2159_v10 }
 0xd3a   : > { %v2844_v11 = vpop.eup %2843 }
 0xd3b   : > { %v2161_v13 = vmul.f32 %v2844_v11, %v2159_v10  ;;  %vm2167_vm7 = vweird.f32 %v2844_v11 }
 0xd3c   : > { %vm2168_vm9 = vmor %vm2166_vm8, %vm2167_vm7 }
 0xd3d   : > { %v2162_v14 = vmul.f32 %v2844_v11, %v2161_v13 }
 0xd3f   : > { %v2163_v15 = vmul.f32 0.5, %v2162_v14 }
 0xd41   : > { %v2164_v16 = vsub.f32 1.5, %v2163_v15 }
 0xd43   : > { %v2165_v17 = vmul.f32 %v2844_v11, %v2164_v16 }
 0xd45   : > { %v2169_v41 = vsel %vm2168_vm9, %v2844_v11, %v2165_v17 }
 0xd46   : > { %v2170_v18 = vmul.f32 %v2169_v41, %v2153_v5 }
 0xd48   : > { %v2171_v19 = vmul.f32 %v3222_v57, %v2170_v18 }
 0xd4a   : > { %v2172_v20 = vadd.f32 %v3227_v59, %v2171_v19 }
 0xd4c   : > { %2173 = vst.msk [vmem:[%s435_s14] sm:$0xff] %vm480_vm0, %v2172_v20 }
 0xd4d   : > { %2900 = shalt.err (!%p2897_p12)
}
 0xd4e   : > { %2744 = dma.vmem_to_hbm [thread:$0]  (%p3052_p5), %s2197_s19, 128, %s2199_s22, %s2179_s29  }
 0xd4f PF: > { %s3539_s25 = sld [smem:[#allocation10_spill]] }
 0xd50   : > { %s3540_s24 = sld [smem:[#allocation8_spill]] }
 0xd55   : > { %p2755_p13 = scmp.ge.s32.totalorder %s3539_s25, 2 }
 0xd56   : > { %s2227_s28 = sand.u32 1, %s3540_s24  }
 0xd57   : > { %p2749_p0 = pnand %p2755_p13, %p3056_p6  ;;  %s2228_s21 = scalar_lea.sflag [#allocation3], %s2227_s28 }
 0xd59   : > { %p2750_p1 = pneg %p2749_p0 }
 0xd5b   : > { %2918 = dma.done.wait (%p2750_p1), %s2228_s21, 128  }
 0xd5c   : > { %2920 = vsyncadd (%p2750_p1), %s2228_s21, 4294967168  ;;  %s2238_s14 = scalar_lea.sflag [#allocation5], %s2227_s28 }
 0xd5d   : > { %2922 = dma.done.wait (%p2750_p1), %s2238_s14, 512  }
 0xd5e   : > { %2924 = vsyncadd (%p2750_p1), %s2238_s14, 4294966784  ;;  %s3542_s28 = sld [smem:[#allocation11_spill]]  ;;  %s3545_s25 = smov %s2931_s26 }
 0xd5f   : > { %s3543_s15 = sld [smem:[#allocation9_spill]] }
 0xd60   : > { %s3544_s27 = sld [smem:[#allocation12_spill]] }
 0xd64   : > { %p27_p5 = scmp.ge.s32.totalorder %s3542_s28, 4  }
 0xd65   : > { %s3546_s26 = smov %s3543_s15 }
 0xd66   :  { %29 = sbr.rel (!%p27_p5) target bundleno = 7 (0x7), region = 129 }
 0xd6b   :  { %2244 = vsyncpa [#allocation3], 1 }
 0xd6c   :  { %2246 = vsyncpa [#allocation3 + $0x1], 1 }
 0xd6d   :  { %2247 = vsyncpa [#allocation5], 1 }
 0xd6e   :  { %2249 = vsyncpa [#allocation5 + $0x1], 1 }

</bundles_post_ra>
